<compile_context>
chip_gen: v6e
topology: v6e:2x2x1
jax: 0.10.0
libtpu: 0.0.40
codegen_flags: <defaults>
</compile_context>

<pallas_src>
import functools
import math

import jax
import jax.numpy as jnp
from jax import lax
from jax.experimental import pallas as pl
from jax.experimental.pallas import tpu as pltpu


def _round_up(x, m):
    return ((x + m - 1) // m) * m


# ----------------------------------------------------------------------------
# Pallas kernel: one (batch-tile, time-chunk) grid step of the LSTM recurrence
# ----------------------------------------------------------------------------
def _encoder_kernel(x_ref, wih_ref, whh_ref, b_ref, h0_ref, c0_ref,
                    out_ref, hn_ref, cn_ref, xg_ref,
                    *, hp, bp, chunk, seq_len, unroll):
    """Block shapes (all (8,128)-aligned):
         x_ref   : (chunk*Bp, Hp)   bf16  time-major embedded inputs, this chunk
         wih_ref : (Hp, 4*Hp)       bf16  W_ih^T, gate k in cols [k*Hp, k*Hp+H)
         whh_ref : (Hp, 4*Hp)       bf16  W_hh^T, same gate packing
         b_ref   : (1, 4*Hp)        f32   b_ih + b_hh, same gate packing
         h0/c0   : (Bp, Hp)         f32   initial state for this batch tile
         out_ref : (chunk*Bp, Hp)   f32   per-step hidden states, this chunk
         hn/cn   : (Bp, Hp)         f32   VMEM-resident across the time axis ->
                                          double as the h/c carry between chunks
         xg_ref  : (chunk*Bp, 4*Hp) f32   scratch: hoisted input projection
    """
    t_chunk = pl.program_id(1)

    # Initialize the resident carries from h0/c0 on the first time chunk.
    @pl.when(t_chunk == 0)
    def _():
        hn_ref[...] = h0_ref[...]
        cn_ref[...] = c0_ref[...]

    # Hoisted input projection for the whole chunk: one batched MXU matmul with
    # the bias folded in.  Only h @ W_hh^T remains on the serial critical path.
    xg_ref[...] = (
        jnp.dot(x_ref[...], wih_ref[...], preferred_element_type=jnp.float32)
        + b_ref[...]
    )

    w_dtype = whh_ref.dtype
    base_t = t_chunk * chunk                 # global index of step 0 of this chunk
    needs_mask = (seq_len % chunk) != 0      # static

    def sigmoid(x):
        # Single-EUP sigmoid: sigmoid(x) = 0.5 * tanh(0.5 * x) + 0.5
        # (the scale/shift are cheap VALU ops on a non-saturated slot).
        return 0.5 * jnp.tanh(0.5 * x) + 0.5

    def step(t, carry):
        h, c = carry                                           # (Bp, Hp) f32
        row = pl.multiple_of(t * bp, bp)                       # sublane-aligned
        # Recurrent matmul: bf16 operands, f32 accumulation.
        gates = xg_ref[pl.ds(row, bp), :] + jnp.dot(
            h.astype(w_dtype), whh_ref[...],
            preferred_element_type=jnp.float32)                # (Bp, 4Hp) f32

        # Each gate slice is a full 128-lane (Hp) block -> whole-vreg VPU/EUP ops.
        i_g = sigmoid(gates[:, 0 * hp:1 * hp])
        f_g = sigmoid(gates[:, 1 * hp:2 * hp])
        g_g = jnp.tanh(gates[:, 2 * hp:3 * hp])
        o_g = sigmoid(gates[:, 3 * hp:4 * hp])

        c_new = f_g * c + i_g * g_g
        h_new = o_g * jnp.tanh(c_new)

        if needs_mask:
            # Freeze the carry for padded timesteps (t >= T).  Scalar f32 mask
            # arithmetic keeps the lowering trivially safe.
            valid = ((base_t + t) < seq_len).astype(jnp.float32)
            h_new = valid * h_new + (1.0 - valid) * h
            c_new = valid * c_new + (1.0 - valid) * c

        out_ref[pl.ds(row, bp), :] = h_new                     # unmasked (8,128) store
        return (h_new, c_new)

    h_fin, c_fin = lax.fori_loop(0, chunk, step,
                                 (hn_ref[...], cn_ref[...]), unroll=unroll)
    hn_ref[...] = h_fin
    cn_ref[...] = c_fin


# ----------------------------------------------------------------------------
# Wrapper: gather, padding, gate-aligned packing, pallas_call, unpadding
# ----------------------------------------------------------------------------
def encoder_forward(indices, hidden, cell_state, params,
                    *, matmul_dtype=jnp.bfloat16, chunk=32):
    """indices: (B, T) int32; hidden/cell_state: (1, B, H) float32."""
    B, T = indices.shape
    V, H = params["embedding"].shape
    Hp = _round_up(H, 128)          # lane-dense hidden size
    Bp = 8                          # one sublane tile of batch rows
    nb = _round_up(B, Bp) // Bp     # number of batch tiles ("parallel" grid axis)
    B_pad = nb * Bp
    G = 4 * Hp

    chunk = max(1, min(chunk, T))   # time-chunk length (grid axis, "arbitrary")
    n_chunks = -(-T // chunk)
    T_pad = n_chunks * chunk

    # Embedding gather stays in HBM (XLA gather), directly time-major, cast to
    # bf16 before padding: table never enters VMEM, half the pad/reshape bytes.
    emb_x = jnp.take(params["embedding"], indices.T, axis=0)   # (T, B, H) f32
    emb_x = emb_x.astype(matmul_dtype)
    x = jnp.pad(emb_x, ((0, T_pad - T), (0, B_pad - B), (0, Hp - H)))
    # Layout: (nb batch tiles, T_pad*Bp, Hp), time-major within a tile.
    x = x.reshape(T_pad, nb, Bp, Hp).transpose(1, 0, 2, 3).reshape(nb, T_pad * Bp, Hp)

    # Pack weights so gate k occupies columns [k*Hp, k*Hp + H); padded rows /
    # columns are zero so padded hidden lanes stay exactly zero in h/c.
    def pack_w(w):                                             # (4H, H) -> (Hp, 4Hp)
        wt = w.T                                               # (H, 4H)
        out = jnp.zeros((Hp, G), jnp.float32)
        for k in range(4):
            out = out.at[:H, k * Hp:k * Hp + H].set(wt[:, k * H:(k + 1) * H])
        return out.astype(matmul_dtype)

    def pack_b(b):                                             # (4H,) -> (1, 4Hp)
        out = jnp.zeros((1, G), jnp.float32)
        for k in range(4):
            out = out.at[0, k * Hp:k * Hp + H].set(b[k * H:(k + 1) * H])
        return out

    wih = pack_w(params["w_ih"])
    whh = pack_w(params["w_hh"])
    bias = pack_b(params["b_ih"] + params["b_hh"])

    h0 = jnp.pad(hidden[0], ((0, B_pad - B), (0, Hp - H))).reshape(nb, Bp, Hp)
    c0 = jnp.pad(cell_state[0], ((0, B_pad - B), (0, Hp - H))).reshape(nb, Bp, Hp)

    kernel = functools.partial(_encoder_kernel, hp=Hp, bp=Bp, chunk=chunk,
                               seq_len=T, unroll=min(chunk, 8))

    out3d, hn, cn = pl.pallas_call(
        kernel,
        grid=(nb, n_chunks),
        in_specs=[
            pl.BlockSpec((None, chunk * Bp, Hp), lambda b, t: (b, t, 0)),  # x chunk
            pl.BlockSpec((Hp, G), lambda b, t: (0, 0)),                    # W_ih^T
            pl.BlockSpec((Hp, G), lambda b, t: (0, 0)),                    # W_hh^T
            pl.BlockSpec((1, G), lambda b, t: (0, 0)),                     # bias
            pl.BlockSpec((None, Bp, Hp), lambda b, t: (b, 0, 0)),          # h0 tile
            pl.BlockSpec((None, Bp, Hp), lambda b, t: (b, 0, 0)),          # c0 tile
        ],
        out_specs=(
            pl.BlockSpec((None, chunk * Bp, Hp), lambda b, t: (b, t, 0)),  # out chunk
            pl.BlockSpec((None, Bp, Hp), lambda b, t: (b, 0, 0)),          # h carry/h_n
            pl.BlockSpec((None, Bp, Hp), lambda b, t: (b, 0, 0)),          # c carry/c_n
        ),
        out_shape=(
            jax.ShapeDtypeStruct((nb, T_pad * Bp, Hp), jnp.float32),
            jax.ShapeDtypeStruct((nb, Bp, Hp), jnp.float32),
            jax.ShapeDtypeStruct((nb, Bp, Hp), jnp.float32),
        ),
        # Per-chunk scratch only: VMEM bounded independent of T.  (Could be
        # stored bf16 on v7x to halve it further; kept f32 for gate precision.)
        scratch_shapes=[pltpu.VMEM((chunk * Bp, G), jnp.float32)],
        compiler_params=pltpu.CompilerParams(
            dimension_semantics=("parallel", "arbitrary")),
    )(x, wih, whh, bias, h0, c0)

    # Un-pad / batch-first (small XLA reshape + slice).
    out = out3d.reshape(nb, T_pad, Bp, Hp).transpose(1, 0, 2, 3)
    out = out.reshape(T_pad, B_pad, Hp)[:T, :B, :H]
    output = jnp.transpose(out, (1, 0, 2))                     # (B, T, H)
    hn = hn.reshape(B_pad, Hp)[:B, :H][None]                   # (1, B, H)
    cn = cn.reshape(B_pad, Hp)[:B, :H][None]                   # (1, B, H)
    return output, hn, cn


# ----------------------------------------------------------------------------
# Pure-JAX reference (same math as the PyTorch module).  matmul_dtype /
# tanh_sigmoid let us build a precision-matched reference for the bf16 kernel.
# ----------------------------------------------------------------------------
def encoder_reference(indices, hidden, cell_state, params,
                      *, matmul_dtype=jnp.float32, tanh_sigmoid=False):
    H = params["embedding"].shape[1]
    emb = jnp.take(params["embedding"], indices, axis=0)       # (B, T, H)
    wih_t = params["w_ih"].T.astype(matmul_dtype)
    whh_t = params["w_hh"].T.astype(matmul_dtype)
    bias = params["b_ih"] + params["b_hh"]

    if tanh_sigmoid:
        sig = lambda x: 0.5 * jnp.tanh(0.5 * x) + 0.5
    else:
        sig = jax.nn.sigmoid

    def cell(carry, x_t):
        h, c = carry
        gates = (jnp.dot(x_t.astype(matmul_dtype), wih_t,
                         preferred_element_type=jnp.float32)
                 + jnp.dot(h.astype(matmul_dtype), whh_t,
                           preferred_element_type=jnp.float32)
                 + bias)
        i_g = sig(gates[:, 0 * H:1 * H])
        f_g = sig(gates[:, 1 * H:2 * H])
        g_g = jnp.tanh(gates[:, 2 * H:3 * H])
        o_g = sig(gates[:, 3 * H:4 * H])
        c_new = f_g * c + i_g * g_g
        h_new = o_g * jnp.tanh(c_new)
        return (h_new, c_new), h_new

    (h_fin, c_fin), outs = lax.scan(cell, (hidden[0], cell_state[0]),
                                    jnp.transpose(emb, (1, 0, 2)))
    return jnp.transpose(outs, (1, 0, 2)), h_fin[None], c_fin[None]


# ----------------------------------------------------------------------------
# Deterministic parameter init (nn.Embedding(padding_idx=2) + nn.LSTM shapes)
# ----------------------------------------------------------------------------
def init_params(key, input_size, hidden_size, padding_idx=2):
    k_emb, k_wih, k_whh, k_bih, k_bhh = jax.random.split(key, 5)
    emb = jax.random.normal(k_emb, (input_size, hidden_size), jnp.float32)
    emb = emb.at[padding_idx].set(0.0)                         # padding_idx row = 0
    bound = 1.0 / math.sqrt(hidden_size)
    u = lambda k, s: jax.random.uniform(k, s, jnp.float32, -bound, bound)
    return {
        "embedding": emb,                                      # (V, H)
        "w_ih": u(k_wih, (4 * hidden_size, hidden_size)),      # (4H, H) gates i,f,g,o
        "w_hh": u(k_whh, (4 * hidden_size, hidden_size)),      # (4H, H)
        "b_ih": u(k_bih, (4 * hidden_size,)),                  # (4H,)
        "b_hh": u(k_bhh, (4 * hidden_size,)),                  # (4H,)
    }


if __name__ == "__main__":
    INPUT_SIZE = 16     # vocab
    HIDDEN = 32

    key = jax.random.PRNGKey(0)
    k_params, k_idx1, k_idx2 = jax.random.split(key, 3)
    params = init_params(k_params, INPUT_SIZE, HIDDEN)

    def run_case(k, batch, seq, chunk):
        indices = jax.random.randint(k, (batch, seq), 0, INPUT_SIZE, jnp.int32)
        indices = indices.at[:, -1].set(2)                     # a padding token
        h0 = jnp.zeros((1, batch, HIDDEN), jnp.float32)        # inithidden
        c0 = jnp.zeros((1, batch, HIDDEN), jnp.float32)        # initcell

        out, hn, cn = jax.block_until_ready(
            encoder_forward(indices, h0, c0, params, chunk=chunk))

        assert out.shape == (batch, seq, HIDDEN)
        assert hn.shape == (1, batch, HIDDEN) and cn.shape == (1, batch, HIDDEN)

        # Tight check vs precision-matched ref (bf16 matmuls, tanh-sigmoid).
        out_m, hn_m, cn_m = encoder_reference(
            indices, h0, c0, params,
            matmul_dtype=jnp.bfloat16, tanh_sigmoid=True)
        assert jnp.allclose(out, out_m, atol=5e-3, rtol=5e-3)
        assert jnp.allclose(hn, hn_m, atol=5e-3, rtol=5e-3)
        assert jnp.allclose(cn, cn_m, atol=5e-3, rtol=5e-3)

        # Looser check vs the pure-f32 reference (module semantics).
        out_r, hn_r, cn_r = encoder_reference(indices, h0, c0, params)
        assert jnp.allclose(out, out_r, atol=5e-2, rtol=5e-2)
        assert jnp.allclose(hn, hn_r, atol=5e-2, rtol=5e-2)
        assert jnp.allclose(cn, cn_r, atol=5e-2, rtol=5e-2)

    run_case(k_idx1, batch=2, seq=8, chunk=8)    # single time chunk
    run_case(k_idx1, batch=2, seq=8, chunk=3)    # multi-chunk carry + tail masking
    run_case(k_idx2, batch=10, seq=5, chunk=4)   # 2 batch tiles ("parallel") + masking

    print("KERNEL_OK")
</pallas_src>

<mosaic_0001>
module attributes {stable_mosaic.version = 11 : i64} {
  func.func @_encoder_kernel(%arg0: i32, %arg1: i32, %arg2: memref<1x64x128xbf16, #tpu.memory_space<vmem>>, %arg3: memref<128x512xbf16, #tpu.memory_space<vmem>>, %arg4: memref<128x512xbf16, #tpu.memory_space<vmem>>, %arg5: memref<1x512xf32, #tpu.memory_space<vmem>>, %arg6: memref<1x8x128xf32, #tpu.memory_space<vmem>>, %arg7: memref<1x8x128xf32, #tpu.memory_space<vmem>>, %arg8: memref<1x64x128xf32, #tpu.memory_space<vmem>>, %arg9: memref<1x8x128xf32, #tpu.memory_space<vmem>>, %arg10: memref<1x8x128xf32, #tpu.memory_space<vmem>>, %arg11: memref<64x512xf32, #tpu.memory_space<vmem>>) attributes {dimension_semantics = [#tpu.dimension_semantics<parallel>, #tpu.dimension_semantics<arbitrary>], iteration_bounds = array<i64: 1, 1>, scalar_prefetch = 0 : i64, scratch_operands = 1 : i64, tpu.core_type = #tpu.core_type<tc>, window_params = [{transform_indices = @transform_0, window_bounds = array<i64: 1, 64, 128>}, {pipeline_mode = #tpu.pipeline_mode<synchronous>, transform_indices = @transform_1, window_bounds = array<i64: 128, 512>}, {pipeline_mode = #tpu.pipeline_mode<synchronous>, transform_indices = @transform_2, window_bounds = array<i64: 128, 512>}, {pipeline_mode = #tpu.pipeline_mode<synchronous>, transform_indices = @transform_3, window_bounds = array<i64: 1, 512>}, {transform_indices = @transform_4, window_bounds = array<i64: 1, 8, 128>}, {transform_indices = @transform_5, window_bounds = array<i64: 1, 8, 128>}, {transform_indices = @transform_6, window_bounds = array<i64: 1, 64, 128>}, {transform_indices = @transform_7, window_bounds = array<i64: 1, 8, 128>}, {transform_indices = @transform_8, window_bounds = array<i64: 1, 8, 128>}]} {
    %c0_i32 = arith.constant 0 : i32
    %0 = arith.cmpi eq, %arg1, %c0_i32 : i32
    %1 = arith.extui %0 : i1 to i32
    %c0_i32_0 = arith.constant 0 : i32
    %2 = arith.cmpi ne, %1, %c0_i32_0 : i32
    scf.if %2 {
      %c0_150 = arith.constant 0 : index
      %c0_151 = arith.constant 0 : index
      %c0_152 = arith.constant 0 : index
      %365 = vector.load %arg6[%c0_150, %c0_151, %c0_152] : memref<1x8x128xf32, #tpu.memory_space<vmem>>, vector<1x8x128xf32>
      %366 = vector.shape_cast %365 : vector<1x8x128xf32> to vector<8x128xf32>
      %c0_153 = arith.constant 0 : index
      %c0_154 = arith.constant 0 : index
      %c0_155 = arith.constant 0 : index
      %367 = vector.load %arg9[%c0_153, %c0_154, %c0_155] : memref<1x8x128xf32, #tpu.memory_space<vmem>>, vector<1x8x128xf32>
      %368 = vector.shape_cast %367 : vector<1x8x128xf32> to vector<8x128xf32>
      %369 = vector.shape_cast %366 : vector<8x128xf32> to vector<1x8x128xf32>
      tpu.vector_store %arg9[%c0_153, %c0_154, %c0_155], %369 {strides = array<i32>} : memref<1x8x128xf32, #tpu.memory_space<vmem>>, vector<1x8x128xf32>,
      %c0_156 = arith.constant 0 : index
      %c0_157 = arith.constant 0 : index
      %c0_158 = arith.constant 0 : index
      %370 = vector.load %arg7[%c0_156, %c0_157, %c0_158] : memref<1x8x128xf32, #tpu.memory_space<vmem>>, vector<1x8x128xf32>
      %371 = vector.shape_cast %370 : vector<1x8x128xf32> to vector<8x128xf32>
      %c0_159 = arith.constant 0 : index
      %c0_160 = arith.constant 0 : index
      %c0_161 = arith.constant 0 : index
      %372 = vector.load %arg10[%c0_159, %c0_160, %c0_161] : memref<1x8x128xf32, #tpu.memory_space<vmem>>, vector<1x8x128xf32>
      %373 = vector.shape_cast %372 : vector<1x8x128xf32> to vector<8x128xf32>
      %374 = vector.shape_cast %371 : vector<8x128xf32> to vector<1x8x128xf32>
      tpu.vector_store %arg10[%c0_159, %c0_160, %c0_161], %374 {strides = array<i32>} : memref<1x8x128xf32, #tpu.memory_space<vmem>>, vector<1x8x128xf32>,
    } else {
    }
    %c0 = arith.constant 0 : index
    %c0_1 = arith.constant 0 : index
    %c0_2 = arith.constant 0 : index
    %3 = vector.load %arg2[%c0, %c0_1, %c0_2] : memref<1x64x128xbf16, #tpu.memory_space<vmem>>, vector<1x64x128xbf16>
    %4 = vector.shape_cast %3 : vector<1x64x128xbf16> to vector<64x128xbf16>
    %c0_3 = arith.constant 0 : index
    %c0_4 = arith.constant 0 : index
    %5 = vector.load %arg3[%c0_3, %c0_4] : memref<128x512xbf16, #tpu.memory_space<vmem>>, vector<128x512xbf16>
    %cst = arith.constant dense<0.000000e+00> : vector<64x512xf32>
    %6 = tpu.matmul %4, %5, %cst {dimension_numbers = #tpu.dot_dimension_numbers<[1], [0], [0], [1], [0, 0, 1, 1], [], []>} : vector<64x128xbf16>, vector<128x512xbf16>, vector<64x512xf32> -> vector<64x512xf32>
    %c0_5 = arith.constant 0 : index
    %c0_6 = arith.constant 0 : index
    %7 = vector.load %arg5[%c0_5, %c0_6] : memref<1x512xf32, #tpu.memory_space<vmem>>, vector<1x512xf32>
    %8 = vector.broadcast %7 : vector<1x512xf32> to vector<64x512xf32>
    %9 = arith.addf %6, %8 : vector<64x512xf32>
    %c0_7 = arith.constant 0 : index
    %c0_8 = arith.constant 0 : index
    %10 = vector.load %arg11[%c0_7, %c0_8] : memref<64x512xf32, #tpu.memory_space<vmem>>, vector<64x512xf32>
    tpu.vector_store %arg11[%c0_7, %c0_8], %9 {strides = array<i32>} : memref<64x512xf32, #tpu.memory_space<vmem>>, vector<64x512xf32>,
    %c0_9 = arith.constant 0 : index
    %c0_10 = arith.constant 0 : index
    %c0_11 = arith.constant 0 : index
    %11 = vector.load %arg9[%c0_9, %c0_10, %c0_11] : memref<1x8x128xf32, #tpu.memory_space<vmem>>, vector<1x8x128xf32>
    %12 = vector.shape_cast %11 : vector<1x8x128xf32> to vector<8x128xf32>
    %c0_12 = arith.constant 0 : index
    %c0_13 = arith.constant 0 : index
    %c0_14 = arith.constant 0 : index
    %13 = vector.load %arg10[%c0_12, %c0_13, %c0_14] : memref<1x8x128xf32, #tpu.memory_space<vmem>>, vector<1x8x128xf32>
    %14 = vector.shape_cast %13 : vector<1x8x128xf32> to vector<8x128xf32>
    %c0_i32_15 = arith.constant 0 : i32
    %c8_i32 = arith.constant 8 : i32
    %15 = arith.muli %c0_i32_15, %c8_i32 : i32
    %16 = tpu.assume_multiple %15, 8 : i32
    %17 = arith.index_cast %16 : i32 to index
    %c0_16 = arith.constant 0 : index
    %18 = vector.load %arg11[%17, %c0_16] : memref<64x512xf32, #tpu.memory_space<vmem>>, vector<8x512xf32>
    %19 = arith.truncf %12 : vector<8x128xf32> to vector<8x128xbf16>
    %c0_17 = arith.constant 0 : index
    %c0_18 = arith.constant 0 : index
    %20 = vector.load %arg4[%c0_17, %c0_18] : memref<128x512xbf16, #tpu.memory_space<vmem>>, vector<128x512xbf16>
    %cst_19 = arith.constant dense<0.000000e+00> : vector<8x512xf32>
    %21 = tpu.matmul %19, %20, %cst_19 {dimension_numbers = #tpu.dot_dimension_numbers<[1], [0], [0], [1], [0, 0, 1, 1], [], []>} : vector<8x128xbf16>, vector<128x512xbf16>, vector<8x512xf32> -> vector<8x512xf32>
    %22 = arith.addf %18, %21 : vector<8x512xf32>
    %23 = vector.extract_strided_slice %22 {offsets = [0, 0], sizes = [8, 128], strides = [1, 1]} : vector<8x512xf32> to vector<8x128xf32>
    %cst_20 = arith.constant 5.000000e-01 : f32
    %24 = vector.broadcast %cst_20 : f32 to vector<8x128xf32>
    %25 = arith.mulf %24, %23 : vector<8x128xf32>
    %26 = math.tanh %25 : vector<8x128xf32>
    %cst_21 = arith.constant 5.000000e-01 : f32
    %27 = vector.broadcast %cst_21 : f32 to vector<8x128xf32>
    %28 = arith.mulf %27, %26 : vector<8x128xf32>
    %cst_22 = arith.constant 5.000000e-01 : f32
    %29 = vector.broadcast %cst_22 : f32 to vector<8x128xf32>
    %30 = arith.addf %28, %29 : vector<8x128xf32>
    %31 = vector.extract_strided_slice %22 {offsets = [0, 128], sizes = [8, 128], strides = [1, 1]} : vector<8x512xf32> to vector<8x128xf32>
    %cst_23 = arith.constant 5.000000e-01 : f32
    %32 = vector.broadcast %cst_23 : f32 to vector<8x128xf32>
    %33 = arith.mulf %32, %31 : vector<8x128xf32>
    %34 = math.tanh %33 : vector<8x128xf32>
    %cst_24 = arith.constant 5.000000e-01 : f32
    %35 = vector.broadcast %cst_24 : f32 to vector<8x128xf32>
    %36 = arith.mulf %35, %34 : vector<8x128xf32>
    %cst_25 = arith.constant 5.000000e-01 : f32
    %37 = vector.broadcast %cst_25 : f32 to vector<8x128xf32>
    %38 = arith.addf %36, %37 : vector<8x128xf32>
    %39 = vector.extract_strided_slice %22 {offsets = [0, 256], sizes = [8, 128], strides = [1, 1]} : vector<8x512xf32> to vector<8x128xf32>
    %40 = math.tanh %39 : vector<8x128xf32>
    %41 = vector.extract_strided_slice %22 {offsets = [0, 384], sizes = [8, 128], strides = [1, 1]} : vector<8x512xf32> to vector<8x128xf32>
    %cst_26 = arith.constant 5.000000e-01 : f32
    %42 = vector.broadcast %cst_26 : f32 to vector<8x128xf32>
    %43 = arith.mulf %42, %41 : vector<8x128xf32>
    %44 = math.tanh %43 : vector<8x128xf32>
    %cst_27 = arith.constant 5.000000e-01 : f32
    %45 = vector.broadcast %cst_27 : f32 to vector<8x128xf32>
    %46 = arith.mulf %45, %44 : vector<8x128xf32>
    %cst_28 = arith.constant 5.000000e-01 : f32
    %47 = vector.broadcast %cst_28 : f32 to vector<8x128xf32>
    %48 = arith.addf %46, %47 : vector<8x128xf32>
    %49 = arith.mulf %38, %14 : vector<8x128xf32>
    %50 = arith.mulf %30, %40 : vector<8x128xf32>
    %51 = arith.addf %49, %50 : vector<8x128xf32>
    %52 = math.tanh %51 : vector<8x128xf32>
    %53 = arith.mulf %48, %52 : vector<8x128xf32>
    %c0_29 = arith.constant 0 : index
    %54 = arith.index_cast %16 : i32 to index
    %c0_30 = arith.constant 0 : index
    %55 = vector.load %arg8[%c0_29, %54, %c0_30] : memref<1x64x128xf32, #tpu.memory_space<vmem>>, vector<1x8x128xf32>
    %56 = vector.shape_cast %55 : vector<1x8x128xf32> to vector<8x128xf32>
    %57 = vector.shape_cast %53 : vector<8x128xf32> to vector<1x8x128xf32>
    tpu.vector_store %arg8[%c0_29, %54, %c0_30], %57 {strides = array<i32>} : memref<1x64x128xf32, #tpu.memory_space<vmem>>, vector<1x8x128xf32>,
    %c1_i32 = arith.constant 1 : i32
    %c8_i32_31 = arith.constant 8 : i32
    %58 = arith.muli %c1_i32, %c8_i32_31 : i32
    %59 = tpu.assume_multiple %58, 8 : i32
    %60 = arith.index_cast %59 : i32 to index
    %c0_32 = arith.constant 0 : index
    %61 = vector.load %arg11[%60, %c0_32] : memref<64x512xf32, #tpu.memory_space<vmem>>, vector<8x512xf32>
    %62 = arith.truncf %53 : vector<8x128xf32> to vector<8x128xbf16>
    %c0_33 = arith.constant 0 : index
    %c0_34 = arith.constant 0 : index
    %63 = vector.load %arg4[%c0_33, %c0_34] : memref<128x512xbf16, #tpu.memory_space<vmem>>, vector<128x512xbf16>
    %cst_35 = arith.constant dense<0.000000e+00> : vector<8x512xf32>
    %64 = tpu.matmul %62, %63, %cst_35 {dimension_numbers = #tpu.dot_dimension_numbers<[1], [0], [0], [1], [0, 0, 1, 1], [], []>} : vector<8x128xbf16>, vector<128x512xbf16>, vector<8x512xf32> -> vector<8x512xf32>
    %65 = arith.addf %61, %64 : vector<8x512xf32>
    %66 = vector.extract_strided_slice %65 {offsets = [0, 0], sizes = [8, 128], strides = [1, 1]} : vector<8x512xf32> to vector<8x128xf32>
    %cst_36 = arith.constant 5.000000e-01 : f32
    %67 = vector.broadcast %cst_36 : f32 to vector<8x128xf32>
    %68 = arith.mulf %67, %66 : vector<8x128xf32>
    %69 = math.tanh %68 : vector<8x128xf32>
    %cst_37 = arith.constant 5.000000e-01 : f32
    %70 = vector.broadcast %cst_37 : f32 to vector<8x128xf32>
    %71 = arith.mulf %70, %69 : vector<8x128xf32>
    %cst_38 = arith.constant 5.000000e-01 : f32
    %72 = vector.broadcast %cst_38 : f32 to vector<8x128xf32>
    %73 = arith.addf %71, %72 : vector<8x128xf32>
    %74 = vector.extract_strided_slice %65 {offsets = [0, 128], sizes = [8, 128], strides = [1, 1]} : vector<8x512xf32> to vector<8x128xf32>
    %cst_39 = arith.constant 5.000000e-01 : f32
    %75 = vector.broadcast %cst_39 : f32 to vector<8x128xf32>
    %76 = arith.mulf %75, %74 : vector<8x128xf32>
    %77 = math.tanh %76 : vector<8x128xf32>
    %cst_40 = arith.constant 5.000000e-01 : f32
    %78 = vector.broadcast %cst_40 : f32 to vector<8x128xf32>
    %79 = arith.mulf %78, %77 : vector<8x128xf32>
    %cst_41 = arith.constant 5.000000e-01 : f32
    %80 = vector.broadcast %cst_41 : f32 to vector<8x128xf32>
    %81 = arith.addf %79, %80 : vector<8x128xf32>
    %82 = vector.extract_strided_slice %65 {offsets = [0, 256], sizes = [8, 128], strides = [1, 1]} : vector<8x512xf32> to vector<8x128xf32>
    %83 = math.tanh %82 : vector<8x128xf32>
    %84 = vector.extract_strided_slice %65 {offsets = [0, 384], sizes = [8, 128], strides = [1, 1]} : vector<8x512xf32> to vector<8x128xf32>
    %cst_42 = arith.constant 5.000000e-01 : f32
    %85 = vector.broadcast %cst_42 : f32 to vector<8x128xf32>
    %86 = arith.mulf %85, %84 : vector<8x128xf32>
    %87 = math.tanh %86 : vector<8x128xf32>
    %cst_43 = arith.constant 5.000000e-01 : f32
    %88 = vector.broadcast %cst_43 : f32 to vector<8x128xf32>
    %89 = arith.mulf %88, %87 : vector<8x128xf32>
    %cst_44 = arith.constant 5.000000e-01 : f32
    %90 = vector.broadcast %cst_44 : f32 to vector<8x128xf32>
    %91 = arith.addf %89, %90 : vector<8x128xf32>
    %92 = arith.mulf %81, %51 : vector<8x128xf32>
    %93 = arith.mulf %73, %83 : vector<8x128xf32>
    %94 = arith.addf %92, %93 : vector<8x128xf32>
    %95 = math.tanh %94 : vector<8x128xf32>
    %96 = arith.mulf %91, %95 : vector<8x128xf32>
    %c0_45 = arith.constant 0 : index
    %97 = arith.index_cast %59 : i32 to index
    %c0_46 = arith.constant 0 : index
    %98 = vector.load %arg8[%c0_45, %97, %c0_46] : memref<1x64x128xf32, #tpu.memory_space<vmem>>, vector<1x8x128xf32>
    %99 = vector.shape_cast %98 : vector<1x8x128xf32> to vector<8x128xf32>
    %100 = vector.shape_cast %96 : vector<8x128xf32> to vector<1x8x128xf32>
    tpu.vector_store %arg8[%c0_45, %97, %c0_46], %100 {strides = array<i32>} : memref<1x64x128xf32, #tpu.memory_space<vmem>>, vector<1x8x128xf32>,
    %c2_i32 = arith.constant 2 : i32
    %c8_i32_47 = arith.constant 8 : i32
    %101 = arith.muli %c2_i32, %c8_i32_47 : i32
    %102 = tpu.assume_multiple %101, 8 : i32
    %103 = arith.index_cast %102 : i32 to index
    %c0_48 = arith.constant 0 : index
    %104 = vector.load %arg11[%103, %c0_48] : memref<64x512xf32, #tpu.memory_space<vmem>>, vector<8x512xf32>
    %105 = arith.truncf %96 : vector<8x128xf32> to vector<8x128xbf16>
    %c0_49 = arith.constant 0 : index
    %c0_50 = arith.constant 0 : index
    %106 = vector.load %arg4[%c0_49, %c0_50] : memref<128x512xbf16, #tpu.memory_space<vmem>>, vector<128x512xbf16>
    %cst_51 = arith.constant dense<0.000000e+00> : vector<8x512xf32>
    %107 = tpu.matmul %105, %106, %cst_51 {dimension_numbers = #tpu.dot_dimension_numbers<[1], [0], [0], [1], [0, 0, 1, 1], [], []>} : vector<8x128xbf16>, vector<128x512xbf16>, vector<8x512xf32> -> vector<8x512xf32>
    %108 = arith.addf %104, %107 : vector<8x512xf32>
    %109 = vector.extract_strided_slice %108 {offsets = [0, 0], sizes = [8, 128], strides = [1, 1]} : vector<8x512xf32> to vector<8x128xf32>
    %cst_52 = arith.constant 5.000000e-01 : f32
    %110 = vector.broadcast %cst_52 : f32 to vector<8x128xf32>
    %111 = arith.mulf %110, %109 : vector<8x128xf32>
    %112 = math.tanh %111 : vector<8x128xf32>
    %cst_53 = arith.constant 5.000000e-01 : f32
    %113 = vector.broadcast %cst_53 : f32 to vector<8x128xf32>
    %114 = arith.mulf %113, %112 : vector<8x128xf32>
    %cst_54 = arith.constant 5.000000e-01 : f32
    %115 = vector.broadcast %cst_54 : f32 to vector<8x128xf32>
    %116 = arith.addf %114, %115 : vector<8x128xf32>
    %117 = vector.extract_strided_slice %108 {offsets = [0, 128], sizes = [8, 128], strides = [1, 1]} : vector<8x512xf32> to vector<8x128xf32>
    %cst_55 = arith.constant 5.000000e-01 : f32
    %118 = vector.broadcast %cst_55 : f32 to vector<8x128xf32>
    %119 = arith.mulf %118, %117 : vector<8x128xf32>
    %120 = math.tanh %119 : vector<8x128xf32>
    %cst_56 = arith.constant 5.000000e-01 : f32
    %121 = vector.broadcast %cst_56 : f32 to vector<8x128xf32>
    %122 = arith.mulf %121, %120 : vector<8x128xf32>
    %cst_57 = arith.constant 5.000000e-01 : f32
    %123 = vector.broadcast %cst_57 : f32 to vector<8x128xf32>
    %124 = arith.addf %122, %123 : vector<8x128xf32>
    %125 = vector.extract_strided_slice %108 {offsets = [0, 256], sizes = [8, 128], strides = [1, 1]} : vector<8x512xf32> to vector<8x128xf32>
    %126 = math.tanh %125 : vector<8x128xf32>
    %127 = vector.extract_strided_slice %108 {offsets = [0, 384], sizes = [8, 128], strides = [1, 1]} : vector<8x512xf32> to vector<8x128xf32>
    %cst_58 = arith.constant 5.000000e-01 : f32
    %128 = vector.broadcast %cst_58 : f32 to vector<8x128xf32>
    %129 = arith.mulf %128, %127 : vector<8x128xf32>
    %130 = math.tanh %129 : vector<8x128xf32>
    %cst_59 = arith.constant 5.000000e-01 : f32
    %131 = vector.broadcast %cst_59 : f32 to vector<8x128xf32>
    %132 = arith.mulf %131, %130 : vector<8x128xf32>
    %cst_60 = arith.constant 5.000000e-01 : f32
    %133 = vector.broadcast %cst_60 : f32 to vector<8x128xf32>
    %134 = arith.addf %132, %133 : vector<8x128xf32>
    %135 = arith.mulf %124, %94 : vector<8x128xf32>
    %136 = arith.mulf %116, %126 : vector<8x128xf32>
    %137 = arith.addf %135, %136 : vector<8x128xf32>
    %138 = math.tanh %137 : vector<8x128xf32>
    %139 = arith.mulf %134, %138 : vector<8x128xf32>
    %c0_61 = arith.constant 0 : index
    %140 = arith.index_cast %102 : i32 to index
    %c0_62 = arith.constant 0 : index
    %141 = vector.load %arg8[%c0_61, %140, %c0_62] : memref<1x64x128xf32, #tpu.memory_space<vmem>>, vector<1x8x128xf32>
    %142 = vector.shape_cast %141 : vector<1x8x128xf32> to vector<8x128xf32>
    %143 = vector.shape_cast %139 : vector<8x128xf32> to vector<1x8x128xf32>
    tpu.vector_store %arg8[%c0_61, %140, %c0_62], %143 {strides = array<i32>} : memref<1x64x128xf32, #tpu.memory_space<vmem>>, vector<1x8x128xf32>,
    %c3_i32 = arith.constant 3 : i32
    %c8_i32_63 = arith.constant 8 : i32
    %144 = arith.muli %c3_i32, %c8_i32_63 : i32
    %145 = tpu.assume_multiple %144, 8 : i32
    %146 = arith.index_cast %145 : i32 to index
    %c0_64 = arith.constant 0 : index
    %147 = vector.load %arg11[%146, %c0_64] : memref<64x512xf32, #tpu.memory_space<vmem>>, vector<8x512xf32>
    %148 = arith.truncf %139 : vector<8x128xf32> to vector<8x128xbf16>
    %c0_65 = arith.constant 0 : index
    %c0_66 = arith.constant 0 : index
    %149 = vector.load %arg4[%c0_65, %c0_66] : memref<128x512xbf16, #tpu.memory_space<vmem>>, vector<128x512xbf16>
    %cst_67 = arith.constant dense<0.000000e+00> : vector<8x512xf32>
    %150 = tpu.matmul %148, %149, %cst_67 {dimension_numbers = #tpu.dot_dimension_numbers<[1], [0], [0], [1], [0, 0, 1, 1], [], []>} : vector<8x128xbf16>, vector<128x512xbf16>, vector<8x512xf32> -> vector<8x512xf32>
    %151 = arith.addf %147, %150 : vector<8x512xf32>
    %152 = vector.extract_strided_slice %151 {offsets = [0, 0], sizes = [8, 128], strides = [1, 1]} : vector<8x512xf32> to vector<8x128xf32>
    %cst_68 = arith.constant 5.000000e-01 : f32
    %153 = vector.broadcast %cst_68 : f32 to vector<8x128xf32>
    %154 = arith.mulf %153, %152 : vector<8x128xf32>
    %155 = math.tanh %154 : vector<8x128xf32>
    %cst_69 = arith.constant 5.000000e-01 : f32
    %156 = vector.broadcast %cst_69 : f32 to vector<8x128xf32>
    %157 = arith.mulf %156, %155 : vector<8x128xf32>
    %cst_70 = arith.constant 5.000000e-01 : f32
    %158 = vector.broadcast %cst_70 : f32 to vector<8x128xf32>
    %159 = arith.addf %157, %158 : vector<8x128xf32>
    %160 = vector.extract_strided_slice %151 {offsets = [0, 128], sizes = [8, 128], strides = [1, 1]} : vector<8x512xf32> to vector<8x128xf32>
    %cst_71 = arith.constant 5.000000e-01 : f32
    %161 = vector.broadcast %cst_71 : f32 to vector<8x128xf32>
    %162 = arith.mulf %161, %160 : vector<8x128xf32>
    %163 = math.tanh %162 : vector<8x128xf32>
    %cst_72 = arith.constant 5.000000e-01 : f32
    %164 = vector.broadcast %cst_72 : f32 to vector<8x128xf32>
    %165 = arith.mulf %164, %163 : vector<8x128xf32>
    %cst_73 = arith.constant 5.000000e-01 : f32
    %166 = vector.broadcast %cst_73 : f32 to vector<8x128xf32>
    %167 = arith.addf %165, %166 : vector<8x128xf32>
    %168 = vector.extract_strided_slice %151 {offsets = [0, 256], sizes = [8, 128], strides = [1, 1]} : vector<8x512xf32> to vector<8x128xf32>
    %169 = math.tanh %168 : vector<8x128xf32>
    %170 = vector.extract_strided_slice %151 {offsets = [0, 384], sizes = [8, 128], strides = [1, 1]} : vector<8x512xf32> to vector<8x128xf32>
    %cst_74 = arith.constant 5.000000e-01 : f32
    %171 = vector.broadcast %cst_74 : f32 to vector<8x128xf32>
    %172 = arith.mulf %171, %170 : vector<8x128xf32>
    %173 = math.tanh %172 : vector<8x128xf32>
    %cst_75 = arith.constant 5.000000e-01 : f32
    %174 = vector.broadcast %cst_75 : f32 to vector<8x128xf32>
    %175 = arith.mulf %174, %173 : vector<8x128xf32>
    %cst_76 = arith.constant 5.000000e-01 : f32
    %176 = vector.broadcast %cst_76 : f32 to vector<8x128xf32>
    %177 = arith.addf %175, %176 : vector<8x128xf32>
    %178 = arith.mulf %167, %137 : vector<8x128xf32>
    %179 = arith.mulf %159, %169 : vector<8x128xf32>
    %180 = arith.addf %178, %179 : vector<8x128xf32>
    %181 = math.tanh %180 : vector<8x128xf32>
    %182 = arith.mulf %177, %181 : vector<8x128xf32>
    %c0_77 = arith.constant 0 : index
    %183 = arith.index_cast %145 : i32 to index
    %c0_78 = arith.constant 0 : index
    %184 = vector.load %arg8[%c0_77, %183, %c0_78] : memref<1x64x128xf32, #tpu.memory_space<vmem>>, vector<1x8x128xf32>
    %185 = vector.shape_cast %184 : vector<1x8x128xf32> to vector<8x128xf32>
    %186 = vector.shape_cast %182 : vector<8x128xf32> to vector<1x8x128xf32>
    tpu.vector_store %arg8[%c0_77, %183, %c0_78], %186 {strides = array<i32>} : memref<1x64x128xf32, #tpu.memory_space<vmem>>, vector<1x8x128xf32>,
    %c4_i32 = arith.constant 4 : i32
    %c8_i32_79 = arith.constant 8 : i32
    %187 = arith.muli %c4_i32, %c8_i32_79 : i32
    %188 = tpu.assume_multiple %187, 8 : i32
    %189 = arith.index_cast %188 : i32 to index
    %c0_80 = arith.constant 0 : index
    %190 = vector.load %arg11[%189, %c0_80] : memref<64x512xf32, #tpu.memory_space<vmem>>, vector<8x512xf32>
    %191 = arith.truncf %182 : vector<8x128xf32> to vector<8x128xbf16>
    %c0_81 = arith.constant 0 : index
    %c0_82 = arith.constant 0 : index
    %192 = vector.load %arg4[%c0_81, %c0_82] : memref<128x512xbf16, #tpu.memory_space<vmem>>, vector<128x512xbf16>
    %cst_83 = arith.constant dense<0.000000e+00> : vector<8x512xf32>
    %193 = tpu.matmul %191, %192, %cst_83 {dimension_numbers = #tpu.dot_dimension_numbers<[1], [0], [0], [1], [0, 0, 1, 1], [], []>} : vector<8x128xbf16>, vector<128x512xbf16>, vector<8x512xf32> -> vector<8x512xf32>
    %194 = arith.addf %190, %193 : vector<8x512xf32>
    %195 = vector.extract_strided_slice %194 {offsets = [0, 0], sizes = [8, 128], strides = [1, 1]} : vector<8x512xf32> to vector<8x128xf32>
    %cst_84 = arith.constant 5.000000e-01 : f32
    %196 = vector.broadcast %cst_84 : f32 to vector<8x128xf32>
    %197 = arith.mulf %196, %195 : vector<8x128xf32>
    %198 = math.tanh %197 : vector<8x128xf32>
    %cst_85 = arith.constant 5.000000e-01 : f32
    %199 = vector.broadcast %cst_85 : f32 to vector<8x128xf32>
    %200 = arith.mulf %199, %198 : vector<8x128xf32>
    %cst_86 = arith.constant 5.000000e-01 : f32
    %201 = vector.broadcast %cst_86 : f32 to vector<8x128xf32>
    %202 = arith.addf %200, %201 : vector<8x128xf32>
    %203 = vector.extract_strided_slice %194 {offsets = [0, 128], sizes = [8, 128], strides = [1, 1]} : vector<8x512xf32> to vector<8x128xf32>
    %cst_87 = arith.constant 5.000000e-01 : f32
    %204 = vector.broadcast %cst_87 : f32 to vector<8x128xf32>
    %205 = arith.mulf %204, %203 : vector<8x128xf32>
    %206 = math.tanh %205 : vector<8x128xf32>
    %cst_88 = arith.constant 5.000000e-01 : f32
    %207 = vector.broadcast %cst_88 : f32 to vector<8x128xf32>
    %208 = arith.mulf %207, %206 : vector<8x128xf32>
    %cst_89 = arith.constant 5.000000e-01 : f32
    %209 = vector.broadcast %cst_89 : f32 to vector<8x128xf32>
    %210 = arith.addf %208, %209 : vector<8x128xf32>
    %211 = vector.extract_strided_slice %194 {offsets = [0, 256], sizes = [8, 128], strides = [1, 1]} : vector<8x512xf32> to vector<8x128xf32>
    %212 = math.tanh %211 : vector<8x128xf32>
    %213 = vector.extract_strided_slice %194 {offsets = [0, 384], sizes = [8, 128], strides = [1, 1]} : vector<8x512xf32> to vector<8x128xf32>
    %cst_90 = arith.constant 5.000000e-01 : f32
    %214 = vector.broadcast %cst_90 : f32 to vector<8x128xf32>
    %215 = arith.mulf %214, %213 : vector<8x128xf32>
    %216 = math.tanh %215 : vector<8x128xf32>
    %cst_91 = arith.constant 5.000000e-01 : f32
    %217 = vector.broadcast %cst_91 : f32 to vector<8x128xf32>
    %218 = arith.mulf %217, %216 : vector<8x128xf32>
    %cst_92 = arith.constant 5.000000e-01 : f32
    %219 = vector.broadcast %cst_92 : f32 to vector<8x128xf32>
    %220 = arith.addf %218, %219 : vector<8x128xf32>
    %221 = arith.mulf %210, %180 : vector<8x128xf32>
    %222 = arith.mulf %202, %212 : vector<8x128xf32>
    %223 = arith.addf %221, %222 : vector<8x128xf32>
    %224 = math.tanh %223 : vector<8x128xf32>
    %225 = arith.mulf %220, %224 : vector<8x128xf32>
    %c0_93 = arith.constant 0 : index
    %226 = arith.index_cast %188 : i32 to index
    %c0_94 = arith.constant 0 : index
    %227 = vector.load %arg8[%c0_93, %226, %c0_94] : memref<1x64x128xf32, #tpu.memory_space<vmem>>, vector<1x8x128xf32>
    %228 = vector.shape_cast %227 : vector<1x8x128xf32> to vector<8x128xf32>
    %229 = vector.shape_cast %225 : vector<8x128xf32> to vector<1x8x128xf32>
    tpu.vector_store %arg8[%c0_93, %226, %c0_94], %229 {strides = array<i32>} : memref<1x64x128xf32, #tpu.memory_space<vmem>>, vector<1x8x128xf32>,
    %c5_i32 = arith.constant 5 : i32
    %c8_i32_95 = arith.constant 8 : i32
    %230 = arith.muli %c5_i32, %c8_i32_95 : i32
    %231 = tpu.assume_multiple %230, 8 : i32
    %232 = arith.index_cast %231 : i32 to index
    %c0_96 = arith.constant 0 : index
    %233 = vector.load %arg11[%232, %c0_96] : memref<64x512xf32, #tpu.memory_space<vmem>>, vector<8x512xf32>
    %234 = arith.truncf %225 : vector<8x128xf32> to vector<8x128xbf16>
    %c0_97 = arith.constant 0 : index
    %c0_98 = arith.constant 0 : index
    %235 = vector.load %arg4[%c0_97, %c0_98] : memref<128x512xbf16, #tpu.memory_space<vmem>>, vector<128x512xbf16>
    %cst_99 = arith.constant dense<0.000000e+00> : vector<8x512xf32>
    %236 = tpu.matmul %234, %235, %cst_99 {dimension_numbers = #tpu.dot_dimension_numbers<[1], [0], [0], [1], [0, 0, 1, 1], [], []>} : vector<8x128xbf16>, vector<128x512xbf16>, vector<8x512xf32> -> vector<8x512xf32>
    %237 = arith.addf %233, %236 : vector<8x512xf32>
    %238 = vector.extract_strided_slice %237 {offsets = [0, 0], sizes = [8, 128], strides = [1, 1]} : vector<8x512xf32> to vector<8x128xf32>
    %cst_100 = arith.constant 5.000000e-01 : f32
    %239 = vector.broadcast %cst_100 : f32 to vector<8x128xf32>
    %240 = arith.mulf %239, %238 : vector<8x128xf32>
    %241 = math.tanh %240 : vector<8x128xf32>
    %cst_101 = arith.constant 5.000000e-01 : f32
    %242 = vector.broadcast %cst_101 : f32 to vector<8x128xf32>
    %243 = arith.mulf %242, %241 : vector<8x128xf32>
    %cst_102 = arith.constant 5.000000e-01 : f32
    %244 = vector.broadcast %cst_102 : f32 to vector<8x128xf32>
    %245 = arith.addf %243, %244 : vector<8x128xf32>
    %246 = vector.extract_strided_slice %237 {offsets = [0, 128], sizes = [8, 128], strides = [1, 1]} : vector<8x512xf32> to vector<8x128xf32>
    %cst_103 = arith.constant 5.000000e-01 : f32
    %247 = vector.broadcast %cst_103 : f32 to vector<8x128xf32>
    %248 = arith.mulf %247, %246 : vector<8x128xf32>
    %249 = math.tanh %248 : vector<8x128xf32>
    %cst_104 = arith.constant 5.000000e-01 : f32
    %250 = vector.broadcast %cst_104 : f32 to vector<8x128xf32>
    %251 = arith.mulf %250, %249 : vector<8x128xf32>
    %cst_105 = arith.constant 5.000000e-01 : f32
    %252 = vector.broadcast %cst_105 : f32 to vector<8x128xf32>
    %253 = arith.addf %251, %252 : vector<8x128xf32>
    %254 = vector.extract_strided_slice %237 {offsets = [0, 256], sizes = [8, 128], strides = [1, 1]} : vector<8x512xf32> to vector<8x128xf32>
    %255 = math.tanh %254 : vector<8x128xf32>
    %256 = vector.extract_strided_slice %237 {offsets = [0, 384], sizes = [8, 128], strides = [1, 1]} : vector<8x512xf32> to vector<8x128xf32>
    %cst_106 = arith.constant 5.000000e-01 : f32
    %257 = vector.broadcast %cst_106 : f32 to vector<8x128xf32>
    %258 = arith.mulf %257, %256 : vector<8x128xf32>
    %259 = math.tanh %258 : vector<8x128xf32>
    %cst_107 = arith.constant 5.000000e-01 : f32
    %260 = vector.broadcast %cst_107 : f32 to vector<8x128xf32>
    %261 = arith.mulf %260, %259 : vector<8x128xf32>
    %cst_108 = arith.constant 5.000000e-01 : f32
    %262 = vector.broadcast %cst_108 : f32 to vector<8x128xf32>
    %263 = arith.addf %261, %262 : vector<8x128xf32>
    %264 = arith.mulf %253, %223 : vector<8x128xf32>
    %265 = arith.mulf %245, %255 : vector<8x128xf32>
    %266 = arith.addf %264, %265 : vector<8x128xf32>
    %267 = math.tanh %266 : vector<8x128xf32>
    %268 = arith.mulf %263, %267 : vector<8x128xf32>
    %c0_109 = arith.constant 0 : index
    %269 = arith.index_cast %231 : i32 to index
    %c0_110 = arith.constant 0 : index
    %270 = vector.load %arg8[%c0_109, %269, %c0_110] : memref<1x64x128xf32, #tpu.memory_space<vmem>>, vector<1x8x128xf32>
    %271 = vector.shape_cast %270 : vector<1x8x128xf32> to vector<8x128xf32>
    %272 = vector.shape_cast %268 : vector<8x128xf32> to vector<1x8x128xf32>
    tpu.vector_store %arg8[%c0_109, %269, %c0_110], %272 {strides = array<i32>} : memref<1x64x128xf32, #tpu.memory_space<vmem>>, vector<1x8x128xf32>,
    %c6_i32 = arith.constant 6 : i32
    %c8_i32_111 = arith.constant 8 : i32
    %273 = arith.muli %c6_i32, %c8_i32_111 : i32
    %274 = tpu.assume_multiple %273, 8 : i32
    %275 = arith.index_cast %274 : i32 to index
    %c0_112 = arith.constant 0 : index
    %276 = vector.load %arg11[%275, %c0_112] : memref<64x512xf32, #tpu.memory_space<vmem>>, vector<8x512xf32>
    %277 = arith.truncf %268 : vector<8x128xf32> to vector<8x128xbf16>
    %c0_113 = arith.constant 0 : index
    %c0_114 = arith.constant 0 : index
    %278 = vector.load %arg4[%c0_113, %c0_114] : memref<128x512xbf16, #tpu.memory_space<vmem>>, vector<128x512xbf16>
    %cst_115 = arith.constant dense<0.000000e+00> : vector<8x512xf32>
    %279 = tpu.matmul %277, %278, %cst_115 {dimension_numbers = #tpu.dot_dimension_numbers<[1], [0], [0], [1], [0, 0, 1, 1], [], []>} : vector<8x128xbf16>, vector<128x512xbf16>, vector<8x512xf32> -> vector<8x512xf32>
    %280 = arith.addf %276, %279 : vector<8x512xf32>
    %281 = vector.extract_strided_slice %280 {offsets = [0, 0], sizes = [8, 128], strides = [1, 1]} : vector<8x512xf32> to vector<8x128xf32>
    %cst_116 = arith.constant 5.000000e-01 : f32
    %282 = vector.broadcast %cst_116 : f32 to vector<8x128xf32>
    %283 = arith.mulf %282, %281 : vector<8x128xf32>
    %284 = math.tanh %283 : vector<8x128xf32>
    %cst_117 = arith.constant 5.000000e-01 : f32
    %285 = vector.broadcast %cst_117 : f32 to vector<8x128xf32>
    %286 = arith.mulf %285, %284 : vector<8x128xf32>
    %cst_118 = arith.constant 5.000000e-01 : f32
    %287 = vector.broadcast %cst_118 : f32 to vector<8x128xf32>
    %288 = arith.addf %286, %287 : vector<8x128xf32>
    %289 = vector.extract_strided_slice %280 {offsets = [0, 128], sizes = [8, 128], strides = [1, 1]} : vector<8x512xf32> to vector<8x128xf32>
    %cst_119 = arith.constant 5.000000e-01 : f32
    %290 = vector.broadcast %cst_119 : f32 to vector<8x128xf32>
    %291 = arith.mulf %290, %289 : vector<8x128xf32>
    %292 = math.tanh %291 : vector<8x128xf32>
    %cst_120 = arith.constant 5.000000e-01 : f32
    %293 = vector.broadcast %cst_120 : f32 to vector<8x128xf32>
    %294 = arith.mulf %293, %292 : vector<8x128xf32>
    %cst_121 = arith.constant 5.000000e-01 : f32
    %295 = vector.broadcast %cst_121 : f32 to vector<8x128xf32>
    %296 = arith.addf %294, %295 : vector<8x128xf32>
    %297 = vector.extract_strided_slice %280 {offsets = [0, 256], sizes = [8, 128], strides = [1, 1]} : vector<8x512xf32> to vector<8x128xf32>
    %298 = math.tanh %297 : vector<8x128xf32>
    %299 = vector.extract_strided_slice %280 {offsets = [0, 384], sizes = [8, 128], strides = [1, 1]} : vector<8x512xf32> to vector<8x128xf32>
    %cst_122 = arith.constant 5.000000e-01 : f32
    %300 = vector.broadcast %cst_122 : f32 to vector<8x128xf32>
    %301 = arith.mulf %300, %299 : vector<8x128xf32>
    %302 = math.tanh %301 : vector<8x128xf32>
    %cst_123 = arith.constant 5.000000e-01 : f32
    %303 = vector.broadcast %cst_123 : f32 to vector<8x128xf32>
    %304 = arith.mulf %303, %302 : vector<8x128xf32>
    %cst_124 = arith.constant 5.000000e-01 : f32
    %305 = vector.broadcast %cst_124 : f32 to vector<8x128xf32>
    %306 = arith.addf %304, %305 : vector<8x128xf32>
    %307 = arith.mulf %296, %266 : vector<8x128xf32>
    %308 = arith.mulf %288, %298 : vector<8x128xf32>
    %309 = arith.addf %307, %308 : vector<8x128xf32>
    %310 = math.tanh %309 : vector<8x128xf32>
    %311 = arith.mulf %306, %310 : vector<8x128xf32>
    %c0_125 = arith.constant 0 : index
    %312 = arith.index_cast %274 : i32 to index
    %c0_126 = arith.constant 0 : index
    %313 = vector.load %arg8[%c0_125, %312, %c0_126] : memref<1x64x128xf32, #tpu.memory_space<vmem>>, vector<1x8x128xf32>
    %314 = vector.shape_cast %313 : vector<1x8x128xf32> to vector<8x128xf32>
    %315 = vector.shape_cast %311 : vector<8x128xf32> to vector<1x8x128xf32>
    tpu.vector_store %arg8[%c0_125, %312, %c0_126], %315 {strides = array<i32>} : memref<1x64x128xf32, #tpu.memory_space<vmem>>, vector<1x8x128xf32>,
    %c7_i32 = arith.constant 7 : i32
    %c8_i32_127 = arith.constant 8 : i32
    %316 = arith.muli %c7_i32, %c8_i32_127 : i32
    %317 = tpu.assume_multiple %316, 8 : i32
    %318 = arith.index_cast %317 : i32 to index
    %c0_128 = arith.constant 0 : index
    %319 = vector.load %arg11[%318, %c0_128] : memref<64x512xf32, #tpu.memory_space<vmem>>, vector<8x512xf32>
    %320 = arith.truncf %311 : vector<8x128xf32> to vector<8x128xbf16>
    %c0_129 = arith.constant 0 : index
    %c0_130 = arith.constant 0 : index
    %321 = vector.load %arg4[%c0_129, %c0_130] : memref<128x512xbf16, #tpu.memory_space<vmem>>, vector<128x512xbf16>
    %cst_131 = arith.constant dense<0.000000e+00> : vector<8x512xf32>
    %322 = tpu.matmul %320, %321, %cst_131 {dimension_numbers = #tpu.dot_dimension_numbers<[1], [0], [0], [1], [0, 0, 1, 1], [], []>} : vector<8x128xbf16>, vector<128x512xbf16>, vector<8x512xf32> -> vector<8x512xf32>
    %323 = arith.addf %319, %322 : vector<8x512xf32>
    %324 = vector.extract_strided_slice %323 {offsets = [0, 0], sizes = [8, 128], strides = [1, 1]} : vector<8x512xf32> to vector<8x128xf32>
    %cst_132 = arith.constant 5.000000e-01 : f32
    %325 = vector.broadcast %cst_132 : f32 to vector<8x128xf32>
    %326 = arith.mulf %325, %324 : vector<8x128xf32>
    %327 = math.tanh %326 : vector<8x128xf32>
    %cst_133 = arith.constant 5.000000e-01 : f32
    %328 = vector.broadcast %cst_133 : f32 to vector<8x128xf32>
    %329 = arith.mulf %328, %327 : vector<8x128xf32>
    %cst_134 = arith.constant 5.000000e-01 : f32
    %330 = vector.broadcast %cst_134 : f32 to vector<8x128xf32>
    %331 = arith.addf %329, %330 : vector<8x128xf32>
    %332 = vector.extract_strided_slice %323 {offsets = [0, 128], sizes = [8, 128], strides = [1, 1]} : vector<8x512xf32> to vector<8x128xf32>
    %cst_135 = arith.constant 5.000000e-01 : f32
    %333 = vector.broadcast %cst_135 : f32 to vector<8x128xf32>
    %334 = arith.mulf %333, %332 : vector<8x128xf32>
    %335 = math.tanh %334 : vector<8x128xf32>
    %cst_136 = arith.constant 5.000000e-01 : f32
    %336 = vector.broadcast %cst_136 : f32 to vector<8x128xf32>
    %337 = arith.mulf %336, %335 : vector<8x128xf32>
    %cst_137 = arith.constant 5.000000e-01 : f32
    %338 = vector.broadcast %cst_137 : f32 to vector<8x128xf32>
    %339 = arith.addf %337, %338 : vector<8x128xf32>
    %340 = vector.extract_strided_slice %323 {offsets = [0, 256], sizes = [8, 128], strides = [1, 1]} : vector<8x512xf32> to vector<8x128xf32>
    %341 = math.tanh %340 : vector<8x128xf32>
    %342 = vector.extract_strided_slice %323 {offsets = [0, 384], sizes = [8, 128], strides = [1, 1]} : vector<8x512xf32> to vector<8x128xf32>
    %cst_138 = arith.constant 5.000000e-01 : f32
    %343 = vector.broadcast %cst_138 : f32 to vector<8x128xf32>
    %344 = arith.mulf %343, %342 : vector<8x128xf32>
    %345 = math.tanh %344 : vector<8x128xf32>
    %cst_139 = arith.constant 5.000000e-01 : f32
    %346 = vector.broadcast %cst_139 : f32 to vector<8x128xf32>
    %347 = arith.mulf %346, %345 : vector<8x128xf32>
    %cst_140 = arith.constant 5.000000e-01 : f32
    %348 = vector.broadcast %cst_140 : f32 to vector<8x128xf32>
    %349 = arith.addf %347, %348 : vector<8x128xf32>
    %350 = arith.mulf %339, %309 : vector<8x128xf32>
    %351 = arith.mulf %331, %341 : vector<8x128xf32>
    %352 = arith.addf %350, %351 : vector<8x128xf32>
    %353 = math.tanh %352 : vector<8x128xf32>
    %354 = arith.mulf %349, %353 : vector<8x128xf32>
    %c0_141 = arith.constant 0 : index
    %355 = arith.index_cast %317 : i32 to index
    %c0_142 = arith.constant 0 : index
    %356 = vector.load %arg8[%c0_141, %355, %c0_142] : memref<1x64x128xf32, #tpu.memory_space<vmem>>, vector<1x8x128xf32>
    %357 = vector.shape_cast %356 : vector<1x8x128xf32> to vector<8x128xf32>
    %358 = vector.shape_cast %354 : vector<8x128xf32> to vector<1x8x128xf32>
    tpu.vector_store %arg8[%c0_141, %355, %c0_142], %358 {strides = array<i32>} : memref<1x64x128xf32, #tpu.memory_space<vmem>>, vector<1x8x128xf32>,
    %c8_i32_143 = arith.constant 8 : i32
    %c0_144 = arith.constant 0 : index
    %c0_145 = arith.constant 0 : index
    %c0_146 = arith.constant 0 : index
    %359 = vector.load %arg9[%c0_144, %c0_145, %c0_146] : memref<1x8x128xf32, #tpu.memory_space<vmem>>, vector<1x8x128xf32>
    %360 = vector.shape_cast %359 : vector<1x8x128xf32> to vector<8x128xf32>
    %361 = vector.shape_cast %354 : vector<8x128xf32> to vector<1x8x128xf32>
    tpu.vector_store %arg9[%c0_144, %c0_145, %c0_146], %361 {strides = array<i32>} : memref<1x8x128xf32, #tpu.memory_space<vmem>>, vector<1x8x128xf32>,
    %c0_147 = arith.constant 0 : index
    %c0_148 = arith.constant 0 : index
    %c0_149 = arith.constant 0 : index
    %362 = vector.load %arg10[%c0_147, %c0_148, %c0_149] : memref<1x8x128xf32, #tpu.memory_space<vmem>>, vector<1x8x128xf32>
    %363 = vector.shape_cast %362 : vector<1x8x128xf32> to vector<8x128xf32>
    %364 = vector.shape_cast %352 : vector<8x128xf32> to vector<1x8x128xf32>
    tpu.vector_store %arg10[%c0_147, %c0_148, %c0_149], %364 {strides = array<i32>} : memref<1x8x128xf32, #tpu.memory_space<vmem>>, vector<1x8x128xf32>,
    return
  }
  func.func @transform_0(%arg0: i32, %arg1: i32) -> (i32, i32, i32) {
    %c0_i32 = arith.constant 0 : i32
    %c0_i32_0 = arith.constant 0 : i32
    return %arg0, %arg1, %c0_i32 : i32, i32, i32
  }
  func.func @transform_1(%arg0: i32, %arg1: i32) -> (i32, i32) {
    %c0_i32 = arith.constant 0 : i32
    %c0_i32_0 = arith.constant 0 : i32
    %c0_i32_1 = arith.constant 0 : i32
    return %c0_i32, %c0_i32_0 : i32, i32
  }
  func.func @transform_2(%arg0: i32, %arg1: i32) -> (i32, i32) {
    %c0_i32 = arith.constant 0 : i32
    %c0_i32_0 = arith.constant 0 : i32
    %c0_i32_1 = arith.constant 0 : i32
    return %c0_i32, %c0_i32_0 : i32, i32
  }
  func.func @transform_3(%arg0: i32, %arg1: i32) -> (i32, i32) {
    %c0_i32 = arith.constant 0 : i32
    %c0_i32_0 = arith.constant 0 : i32
    %c0_i32_1 = arith.constant 0 : i32
    return %c0_i32, %c0_i32_0 : i32, i32
  }
  func.func @transform_4(%arg0: i32, %arg1: i32) -> (i32, i32, i32) {
    %c0_i32 = arith.constant 0 : i32
    %c0_i32_0 = arith.constant 0 : i32
    %c0_i32_1 = arith.constant 0 : i32
    return %arg0, %c0_i32, %c0_i32_0 : i32, i32, i32
  }
  func.func @transform_5(%arg0: i32, %arg1: i32) -> (i32, i32, i32) {
    %c0_i32 = arith.constant 0 : i32
    %c0_i32_0 = arith.constant 0 : i32
    %c0_i32_1 = arith.constant 0 : i32
    return %arg0, %c0_i32, %c0_i32_0 : i32, i32, i32
  }
  func.func @transform_6(%arg0: i32, %arg1: i32) -> (i32, i32, i32) {
    %c0_i32 = arith.constant 0 : i32
    %c0_i32_0 = arith.constant 0 : i32
    return %arg0, %arg1, %c0_i32 : i32, i32, i32
  }
  func.func @transform_7(%arg0: i32, %arg1: i32) -> (i32, i32, i32) {
    %c0_i32 = arith.constant 0 : i32
    %c0_i32_0 = arith.constant 0 : i32
    %c0_i32_1 = arith.constant 0 : i32
    return %arg0, %c0_i32, %c0_i32_0 : i32, i32, i32
  }
  func.func @transform_8(%arg0: i32, %arg1: i32) -> (i32, i32, i32) {
    %c0_i32 = arith.constant 0 : i32
    %c0_i32_0 = arith.constant 0 : i32
    %c0_i32_1 = arith.constant 0 : i32
    return %arg0, %c0_i32, %c0_i32_0 : i32, i32, i32
  }
}

</mosaic_0001>

<bundles_post_ra>
// kernel: tpu_custom_call.1
= control target key start
LH: loop header
LB: loop body
LE: loop exit
PB: predicated region body
PF: predicated region fallthrough
CT: control target
= control target key end

     0   :  { %14 = vsyncpa [#allocation4], 0  ;;  %s4375_s0 = inlined_call_operand.hbm [shape: bf16[1,64,128], index: 0, kind: input, shape index: {}]   ;;  %s4376_s1 = inlined_call_operand.hbm [shape: bf16[128,512], index: 1, kind: input, shape index: {}]   ;;  %s4377_s2 = inlined_call_operand.hbm [shape: bf16[128,512], index: 2, kind: input, shape index: {}]   ;;  %s4378_s3 = inlined_call_operand.hbm [shape: f32[1,512], index: 3, kind: input, shape index: {}]   ;;  %s4379_s4 = inlined_call_operand.hbm [shape: f32[1,8,128], index: 4, kind: input, shape index: {}]   ;;  %s4380_s5 = inlined_call_operand.vmem [shape: f32[1,8,128], index: 5, kind: input, shape index: {}]   ;;  %s4381_s6 = inlined_call_operand.hbm [shape: f32[1,64,128], index: 6, kind: output, shape index: {0}]   ;;  %s4382_s7 = inlined_call_operand.hbm [shape: f32[1,8,128], index: 7, kind: output, shape index: {1}]   ;;  %s4383_s8 = inlined_call_operand.hbm [shape: f32[1,8,128], index: 8, kind: output, shape index: {2}]  }
   0x1   :  { %15 = vsyncpa [#allocation7], 0 }
   0x2   :  { %16 = vsyncpa [#allocation10], 0 }
   0x3   :  { %17 = vsyncpa [#allocation5], 0 }
   0x4   :  { %18 = vsyncpa [#allocation14], 0  ;;  %s3734_s27 = smov [#allocation6]  }
   0x5   :  { %s36_s28 = sshll.u32 %s3734_s27, 4  ;;  %s37_s28 = int_to_ptr.vmem [resolvable:$true] %s36_s28 }
   0x6   :  { %s3572_s29 = scalar_lea.vmem %s37_s28, 4096  ;;  %p3577_p1 = scmp.lt.s32.totalorder %s37_s28, %s37_s28 }
   0x7   :  { %p3573_p0 = scmp.ne.s32.totalorder %s37_s28, %s3572_s29  ;;  %p3578_p2 = scmp.lt.s32.totalorder %s3572_s29, %s3572_s29 }
   0x9   :  { %p3579_p3 = por %p3578_p2, %p3577_p1 }
   0xb   :  { %p3580_p4 = pnand %p3579_p3, %p3573_p0 }
   0xd   :  { %3583 = shalt.err (!%p3580_p4)
}
   0xe   :  { %s3735_s30 = smov 256   ;;  %s3736_s9 = smov 16  }
   0xf   :  { %42 = dma.hbm_to_vmem [thread:$0]  %s4376_s1, 4096, %s37_s28, [#allocation7], %s3735_s30, %s3735_s30, %s3736_s9  }
  0x10   :  { %s3737_s12 = smov [#allocation9]   ;;  %s3738_s14 = smov [#allocation3]  }
  0x11   :  { %s61_s13 = sshll.u32 %s3737_s12, 4  ;;  %s24_s15 = sshll.u32 %s3738_s14, 4  ;;  %s62_s13 = int_to_ptr.vmem [resolvable:$true] %s61_s13  ;;  %s25_s15 = int_to_ptr.vmem [resolvable:$true] %s24_s15 }
  0x12   :  { %s3592_s16 = scalar_lea.vmem %s62_s13, 64  ;;  %p3597_p6 = scmp.lt.s32.totalorder %s62_s13, %s62_s13 }
  0x13   :  { %p3593_p5 = scmp.ne.s32.totalorder %s62_s13, %s3592_s16  ;;  %p3598_p7 = scmp.lt.s32.totalorder %s3592_s16, %s3592_s16 }
  0x15   :  { %p3599_p8 = por %p3598_p7, %p3597_p6 }
  0x17   :  { %p3600_p9 = pnand %p3599_p8, %p3593_p5 }
  0x19   :  { %3603 = shalt.err (!%p3600_p9)
}
  0x1a   :  { %64 = dma.hbm_to_vmem [thread:$0]  %s4378_s3, 64, %s62_s13, [#allocation10]  }
  0x1b   :  { %s3612_s19 = scalar_lea.vmem %s25_s15, 512  ;;  %p3617_p11 = scmp.lt.s32.totalorder %s25_s15, %s25_s15 }
  0x1c   :  { %p3613_p10 = scmp.ne.s32.totalorder %s25_s15, %s3612_s19  ;;  %p3618_p12 = scmp.lt.s32.totalorder %s3612_s19, %s3612_s19 }
  0x1e   :  { %p3619_p13 = por %p3618_p12, %p3617_p11 }
  0x20   :  { %p3620_p0 = pnand %p3619_p13, %p3613_p10 }
  0x22   :  { %3623 = shalt.err (!%p3620_p0)
}
  0x23   :  { %s3739_s1 = smov 64   ;;  %s3740_s20 = smov 4  }
  0x24   :  { %30 = dma.hbm_to_vmem [thread:$0]  %s4375_s0, 512, %s25_s15, [#allocation4], %s3739_s1, %s3739_s1, %s3740_s20  }
  0x25   :  { %s3741_s23 = smov [#allocation8]   ;;  %s3742_s25 = smov [#allocation11]  }
  0x26   :  { %s48_s24 = sshll.u32 %s3741_s23, 4  ;;  %s71_s26 = sshll.u32 %s3742_s25, 4  ;;  %s49_s24 = int_to_ptr.vmem [resolvable:$true] %s48_s24  ;;  %s72_s26 = int_to_ptr.vmem [resolvable:$true] %s71_s26 }
  0x27   :  { %s3632_s3 = scalar_lea.vmem %s49_s24, 4096  ;;  %p3637_p2 = scmp.lt.s32.totalorder %s49_s24, %s49_s24 }
  0x28   :  { %p3633_p1 = scmp.ne.s32.totalorder %s49_s24, %s3632_s3  ;;  %p3638_p3 = scmp.lt.s32.totalorder %s3632_s3, %s3632_s3 }
  0x2a   :  { %p3639_p4 = por %p3638_p3, %p3637_p2 }
  0x2c   :  { %p3640_p5 = pnand %p3639_p4, %p3633_p1 }
  0x2e   :  { %3643 = shalt.err (!%p3640_p5)
}
  0x2f   :  { %54 = dma.hbm_to_vmem [thread:$0]  %s4377_s2, 4096, %s49_s24, [#allocation7], %s3735_s30, %s3735_s30, %s3736_s9  }
  0x30   :  { %s3652_s0 = scalar_lea.vmem %s72_s26, 128  ;;  %p3657_p7 = scmp.lt.s32.totalorder %s72_s26, %s72_s26 }
  0x31   :  { %p3653_p6 = scmp.ne.s32.totalorder %s72_s26, %s3652_s0  ;;  %p3658_p8 = scmp.lt.s32.totalorder %s3652_s0, %s3652_s0 }
  0x33   :  { %p3659_p9 = por %p3658_p8, %p3657_p7 }
  0x35   :  { %p3660_p10 = pnand %p3659_p9, %p3653_p6 }
  0x37   :  { %3663 = shalt.err (!%p3660_p10)
}
  0x38   :  { %74 = dma.hbm_to_vmem [thread:$0]  %s4379_s4, 128, %s72_s26, [#allocation10]  }
  0x39   :  { %3724 = dma.done.wait [#allocation4], 512  }
  0x3a   :  { %3725 = vsyncadd [#allocation4], 4294966784 }
  0x3b   :  { %3726 = dma.done.wait [#allocation7], 8192  }
  0x3c   :  { %3727 = vsyncadd [#allocation7], 4294959104 }
  0x3d   :  { %3728 = dma.done.wait [#allocation10], 192  }
  0x3e   :  { %3729 = vsyncadd [#allocation10], 4294967104  ;;  %v4384_v0 = vmov 0   ;;  %v3336_v1 = vld [vmem:[#allocation6 + $0xe4] ss:$16 sps:$4 sm:$0xff]   ;;  %v3397_v44 = vld [vmem:[#allocation3 + $0x8] sm:$0xff]  }
  0x3f   :  { %379 = vmatprep.mubr.bf16.mxu0 %v4384_v0  ;;  %452 = vmatprep.mubr.bf16.mxu1 %v4384_v0  ;;  %v3338_v2 = vld [vmem:[#allocation6 + $0xec] ss:$16 sps:$4 sm:$0xff]   ;;  %v3340_v3 = vld [vmem:[#allocation6 + $0xe0] ss:$16 sps:$4 sm:$0xff]   ;;  %v3341_v4 = vld [vmem:[#allocation6 + $0xe8] ss:$16 sps:$4 sm:$0xff]  }
  0x40   :  { %347 = vmatprep.subr.bf16.mxu0 %v3336_v1  ;;  %420 = vmatprep.subr.bf16.mxu1 %v3338_v2  ;;  %v3342_v5 = vld [vmem:[#allocation6 + $0xc4] ss:$16 sps:$4 sm:$0xff]   ;;  %v3344_v6 = vld [vmem:[#allocation6 + $0xcc] ss:$16 sps:$4 sm:$0xff]   ;;  %v3346_v7 = vld [vmem:[#allocation6 + $0xc0] ss:$16 sps:$4 sm:$0xff]  }
  0x41   :  { %348 = vmatpush1.bf16.msra.mxu0 %v3340_v3  ;;  %421 = vmatpush1.bf16.msra.mxu1 %v3341_v4  ;;  %v3347_v8 = vld [vmem:[#allocation6 + $0xc8] ss:$16 sps:$4 sm:$0xff]   ;;  %v3348_v9 = vld [vmem:[#allocation6 + $0xa4] ss:$16 sps:$4 sm:$0xff]   ;;  %v3350_v10 = vld [vmem:[#allocation6 + $0xac] ss:$16 sps:$4 sm:$0xff]  }
  0x42   :  { %349 = vmatprep.subr.bf16.mxu0 %v3342_v5  ;;  %422 = vmatprep.subr.bf16.mxu1 %v3344_v6  ;;  %v3352_v11 = vld [vmem:[#allocation6 + $0xa0] ss:$16 sps:$4 sm:$0xff]   ;;  %v3353_v12 = vld [vmem:[#allocation6 + $0xa8] ss:$16 sps:$4 sm:$0xff]   ;;  %v3354_v13 = vld [vmem:[#allocation6 + $0x84] ss:$16 sps:$4 sm:$0xff]  }
  0x43   :  { %v3356_v14 = vld [vmem:[#allocation6 + $0x8c] ss:$16 sps:$4 sm:$0xff]   ;;  %v3358_v15 = vld [vmem:[#allocation6 + $0x80] ss:$16 sps:$4 sm:$0xff]   ;;  %v3359_v16 = vld [vmem:[#allocation6 + $0x88] ss:$16 sps:$4 sm:$0xff]  }
  0x44   :  { %v3360_v17 = vld [vmem:[#allocation6 + $0x64] ss:$16 sps:$4 sm:$0xff]   ;;  %v3362_v18 = vld [vmem:[#allocation6 + $0x6c] ss:$16 sps:$4 sm:$0xff]   ;;  %v3364_v19 = vld [vmem:[#allocation6 + $0x60] ss:$16 sps:$4 sm:$0xff]  }
  0x45   :  { %350 = vmatpush1.bf16.msra.mxu0 %v3346_v7  ;;  %423 = vmatpush1.bf16.msra.mxu1 %v3347_v8  ;;  %v3365_v20 = vld [vmem:[#allocation6 + $0x68] ss:$16 sps:$4 sm:$0xff]   ;;  %v3366_v21 = vld [vmem:[#allocation6 + $0x44] ss:$16 sps:$4 sm:$0xff]   ;;  %v3368_v22 = vld [vmem:[#allocation6 + $0x4c] ss:$16 sps:$4 sm:$0xff]   ;;  %v143_v8 = vlaneseq }
  0x46   :  { %351 = vmatprep.subr.bf16.mxu0 %v3348_v9  ;;  %424 = vmatprep.subr.bf16.mxu1 %v3350_v10  ;;  %v3370_v23 = vld [vmem:[#allocation6 + $0x40] ss:$16 sps:$4 sm:$0xff]   ;;  %v3371_v24 = vld [vmem:[#allocation6 + $0x48] ss:$16 sps:$4 sm:$0xff]   ;;  %v3372_v25 = vld [vmem:[#allocation6 + $0x24] ss:$16 sps:$4 sm:$0xff]  }
  0x47   :  { %v3374_v26 = vld [vmem:[#allocation6 + $0x2c] ss:$16 sps:$4 sm:$0xff]   ;;  %v3376_v27 = vld [vmem:[#allocation6 + $0x20] ss:$16 sps:$4 sm:$0xff]   ;;  %v3377_v28 = vld [vmem:[#allocation6 + $0x28] ss:$16 sps:$4 sm:$0xff]  }
  0x48   :  { %v3378_v29 = vld [vmem:[#allocation6 + $0x4] ss:$16 sps:$4 sm:$0xff]   ;;  %v3380_v30 = vld [vmem:[#allocation6 + $0xc] ss:$16 sps:$4 sm:$0xff]   ;;  %v3382_v31 = vld [vmem:[#allocation6] ss:$16 sps:$4 sm:$0xff]  }
  0x49   :  { %352 = vmatpush1.bf16.msra.mxu0 %v3352_v11  ;;  %425 = vmatpush1.bf16.msra.mxu1 %v3353_v12  ;;  %v3383_v32 = vld [vmem:[#allocation6 + $0x8] ss:$16 sps:$4 sm:$0xff]   ;;  %v3817_v33 = vld [vmem:[#allocation8 + $0xe4] ss:$16 sps:$4 sm:$0xff]   ;;  %v3819_v34 = vld [vmem:[#allocation8 + $0xec] ss:$16 sps:$4 sm:$0xff]  }
  0x4a   :  { %353 = vmatprep.subr.bf16.mxu0 %v3354_v13  ;;  %426 = vmatprep.subr.bf16.mxu1 %v3356_v14  ;;  %v3384_v35 = vld [vmem:[#allocation3] sm:$0xff]   ;;  %v3823_v37 = vld [vmem:[#allocation8 + $0xe8] ss:$16 sps:$4 sm:$0xff]   ;;  %v3829_v39 = vld [vmem:[#allocation8 + $0xcc] ss:$16 sps:$4 sm:$0xff]   ;;  %v144_v9 = vshrl.u32 %v143_v8, 7 }
  0x4b   :  { %v3821_v36 = vld [vmem:[#allocation8 + $0xe0] ss:$16 sps:$4 sm:$0xff]   ;;  %v3827_v38 = vld [vmem:[#allocation8 + $0xc4] ss:$16 sps:$4 sm:$0xff]   ;;  %v3835_v41 = vld [vmem:[#allocation8 + $0xc8] ss:$16 sps:$4 sm:$0xff]  }
  0x4c   :  { %v3831_v40 = vld [vmem:[#allocation8 + $0xc0] ss:$16 sps:$4 sm:$0xff]   ;;  %v3839_v42 = vld [vmem:[#allocation8 + $0xa4] ss:$16 sps:$4 sm:$0xff]   ;;  %v3841_v43 = vld [vmem:[#allocation8 + $0xac] ss:$16 sps:$4 sm:$0xff]  }
  0x4d   :  { %354 = vmatpush1.bf16.msra.mxu0 %v3358_v15  ;;  %427 = vmatpush1.bf16.msra.mxu1 %v3359_v16  ;;  %v3845_v45 = vld [vmem:[#allocation8 + $0xa0] ss:$16 sps:$4 sm:$0xff]   ;;  %v3847_v46 = vld [vmem:[#allocation8 + $0xa8] ss:$16 sps:$4 sm:$0xff]   ;;  %v3851_v47 = vld [vmem:[#allocation8 + $0x84] ss:$16 sps:$4 sm:$0xff]  }
  0x4e   :  { %355 = vmatprep.subr.bf16.mxu0 %v3360_v17  ;;  %428 = vmatprep.subr.bf16.mxu1 %v3362_v18  ;;  %v3855_v48 = vld [vmem:[#allocation8 + $0x8c] ss:$16 sps:$4 sm:$0xff]   ;;  %v3857_v49 = vld [vmem:[#allocation8 + $0x80] ss:$16 sps:$4 sm:$0xff]   ;;  %v3859_v50 = vld [vmem:[#allocation8 + $0x88] ss:$16 sps:$4 sm:$0xff]  }
  0x4f   :  { %v3863_v51 = vld [vmem:[#allocation8 + $0x64] ss:$16 sps:$4 sm:$0xff]   ;;  %v3867_v52 = vld [vmem:[#allocation8 + $0x6c] ss:$16 sps:$4 sm:$0xff]   ;;  %v3871_v54 = vld [vmem:[#allocation8 + $0x60] ss:$16 sps:$4 sm:$0xff]  }
  0x50   :  { %v3410_v53 = vld [vmem:[#allocation3 + $0x10] sm:$0xff]   ;;  %v3873_v55 = vld [vmem:[#allocation8 + $0x68] ss:$16 sps:$4 sm:$0xff]   ;;  %v3877_v57 = vld [vmem:[#allocation8 + $0x4c] ss:$16 sps:$4 sm:$0xff]   ;;  %v153_v10 = vsub.s32 2, %v144_v9 }
  0x51   :  { %356 = vmatpush1.bf16.msra.mxu0 %v3364_v19  ;;  %429 = vmatpush1.bf16.msra.mxu1 %v3365_v20  ;;  %v3875_v56 = vld [vmem:[#allocation8 + $0x44] ss:$16 sps:$4 sm:$0xff]   ;;  %v3883_v58 = vld [vmem:[#allocation8 + $0x40] ss:$16 sps:$4 sm:$0xff]   ;;  %v3885_v59 = vld [vmem:[#allocation8 + $0x48] ss:$16 sps:$4 sm:$0xff]  }
  0x52   :  { %357 = vmatprep.subr.bf16.mxu0 %v3366_v21  ;;  %430 = vmatprep.subr.bf16.mxu1 %v3368_v22  ;;  %v3887_v60 = vld [vmem:[#allocation8 + $0x24] ss:$16 sps:$4 sm:$0xff]   ;;  %v3889_v61 = vld [vmem:[#allocation8 + $0x2c] ss:$16 sps:$4 sm:$0xff]   ;;  %v3897_v63 = vld [vmem:[#allocation8 + $0x20] ss:$16 sps:$4 sm:$0xff]  }
  0x53   :  { %v3423_v62 = vld [vmem:[#allocation3 + $0x18] sm:$0xff]   ;;  %v3901_v2 = vld [vmem:[#allocation8 + $0x4] ss:$16 sps:$4 sm:$0xff]   ;;  %v3911_v4 = vld [vmem:[#allocation8] ss:$16 sps:$4 sm:$0xff]   ;;  %v145_v11 = vsub.s32 0, %v144_v9 }
  0x54   :  { %v3899_v1 = vld [vmem:[#allocation8 + $0x28] ss:$16 sps:$4 sm:$0xff]   ;;  %v3903_v3 = vld [vmem:[#allocation8 + $0xc] ss:$16 sps:$4 sm:$0xff]   ;;  %v157_v12 = vsub.s32 3, %v144_v9  ;;  %v149_v17 = vsub.s32 1, %v144_v9 }
  0x55   :  { %358 = vmatpush1.bf16.msra.mxu0 %v3370_v23  ;;  %431 = vmatpush1.bf16.msra.mxu1 %v3371_v24  ;;  %v3913_v5 = vld [vmem:[#allocation8 + $0x8] ss:$16 sps:$4 sm:$0xff]   ;;  %v141_v13 = vld [vmem:[#allocation9] sm:$0xf]  ;;  %s3745_s9 = smov [#allocation12]   ;;  %s3746_s12 = smov [#allocation15]  }
  0x56   :  { %359 = vmatprep.subr.bf16.mxu0 %v3372_v25  ;;  %432 = vmatprep.subr.bf16.mxu1 %v3374_v26  ;;  %v97_v6 = vld [vmem:[#allocation11] sm:$0xff]  ;;  %v3961_v16 = vrot.slane %v141_v13, %v153_v10  ;;  %v146_v20 = vrot.slane %v141_v13, %v145_v11  ;;  %v3967_v21 = vrot.slane %v141_v13, %v157_v12  ;;  %s2981_s11 = sshll.u32 %s3745_s9, 4  ;;  %s3004_s13 = sshll.u32 %s3746_s12, 4  ;;  %s2982_s11 = int_to_ptr.vmem [resolvable:$true] %s2981_s11  ;;  %s3005_s13 = int_to_ptr.vmem [resolvable:$true] %s3004_s13 }
  0x57   :  { %v534_v7 = vpack.c.bf16 %v97_v6, %v97_v6  ;;  %v150_v24 = vrot.slane %v141_v13, %v149_v17 }
  0x59   :  { %360 = vmatpush1.bf16.msra.mxu0 %v3376_v27  ;;  %433 = vmatpush1.bf16.msra.mxu1 %v3377_v28 }
  0x5a   :  { %361 = vmatprep.subr.bf16.mxu0 %v3378_v29  ;;  %434 = vmatprep.subr.bf16.mxu1 %v3380_v30 }
  0x5d   :  { %362 = vmatpush1.bf16.msra.mxu0 %v3382_v31  ;;  %435 = vmatpush1.bf16.msra.mxu1 %v3383_v32 }
  0x5e   :  { %727 = vmatprep.subr.bf16.mxu0 %v3817_v33  ;;  %768 = vmatprep.subr.bf16.mxu1 %v3819_v34 }
  0x60   :  { %380 = vmatmul.mubr.bf16.vlgmr.msra.gmra.mxu0 %v3384_v35  ;;  %453 = vmatmul.mubr.bf16.vlgmr.msra.gmra.mxu1 %v3384_v35 }
  0x61   :  { %728 = vmatpush1.bf16.msra.mxu0 %v3821_v36  ;;  %769 = vmatpush1.bf16.msra.mxu1 %v3823_v37 }
  0x62   :  { %729 = vmatprep.subr.bf16.mxu0 %v3827_v38  ;;  %770 = vmatprep.subr.bf16.mxu1 %v3829_v39 }
  0x63   :  { %389 = vmatprep.mubr.bf16.mxu0 %v4384_v0  ;;  %462 = vmatprep.mubr.bf16.mxu1 %v4384_v0 }
  0x65   :  { %730 = vmatpush1.bf16.msra.mxu0 %v3831_v40  ;;  %771 = vmatpush1.bf16.msra.mxu1 %v3835_v41 }
  0x66   :  { %731 = vmatprep.subr.bf16.mxu0 %v3839_v42  ;;  %772 = vmatprep.subr.bf16.mxu1 %v3841_v43 }
  0x68   :  { %390 = vmatmul.mubr.bf16.gmra.mxu0 %v3397_v44  ;;  %463 = vmatmul.mubr.bf16.gmra.mxu1 %v3397_v44 }
  0x69   :  { %732 = vmatpush1.bf16.msra.mxu0 %v3845_v45  ;;  %773 = vmatpush1.bf16.msra.mxu1 %v3847_v46 }
  0x6a   :  { %733 = vmatprep.subr.bf16.mxu0 %v3851_v47  ;;  %774 = vmatprep.subr.bf16.mxu1 %v3855_v48 }
  0x6b   :  { %399 = vmatprep.mubr.bf16.mxu0 %v4384_v0  ;;  %472 = vmatprep.mubr.bf16.mxu1 %v4384_v0 }
  0x6d   :  { %734 = vmatpush1.bf16.msra.mxu0 %v3857_v49  ;;  %775 = vmatpush1.bf16.msra.mxu1 %v3859_v50 }
  0x6e   :  { %735 = vmatprep.subr.bf16.mxu0 %v3863_v51  ;;  %776 = vmatprep.subr.bf16.mxu1 %v3867_v52 }
  0x70   :  { %400 = vmatmul.mubr.bf16.gmra.mxu0 %v3410_v53  ;;  %473 = vmatmul.mubr.bf16.gmra.mxu1 %v3410_v53 }
  0x71   :  { %736 = vmatpush1.bf16.msra.mxu0 %v3871_v54  ;;  %777 = vmatpush1.bf16.msra.mxu1 %v3873_v55 }
  0x72   :  { %737 = vmatprep.subr.bf16.mxu0 %v3875_v56  ;;  %778 = vmatprep.subr.bf16.mxu1 %v3877_v57 }
  0x73   :  { %409 = vmatprep.mubr.bf16.mxu0 %v4384_v0  ;;  %482 = vmatprep.mubr.bf16.mxu1 %v4384_v0 }
  0x75   :  { %738 = vmatpush1.bf16.msra.mxu0 %v3883_v58  ;;  %779 = vmatpush1.bf16.msra.mxu1 %v3885_v59 }
  0x76   :  { %739 = vmatprep.subr.bf16.mxu0 %v3887_v60  ;;  %780 = vmatprep.subr.bf16.mxu1 %v3889_v61 }
  0x78   :  { %410 = vmatmul.mubr.bf16.gmra.mxu0 %v3423_v62  ;;  %483 = vmatmul.mubr.bf16.gmra.mxu1 %v3423_v62 }
  0x79   :  { %740 = vmatpush1.bf16.msra.mxu0 %v3897_v63  ;;  %781 = vmatpush1.bf16.msra.mxu1 %v3899_v1 }
  0x7a   :  { %741 = vmatprep.subr.bf16.mxu0 %v3901_v2  ;;  %782 = vmatprep.subr.bf16.mxu1 %v3903_v3 }
  0x7b   :  { %759 = vmatprep.mubr.bf16.mxu0 %v4384_v0  ;;  %800 = vmatprep.mubr.bf16.mxu1 %v4384_v0 }
  0x7d   :  { %742 = vmatpush1.bf16.msra.mxu0 %v3911_v4  ;;  %783 = vmatpush1.bf16.msra.mxu1 %v3913_v5 }
  0x7e   :  { %1032 = vmatprep.subr.bf16.mxu0 %v3817_v33  ;;  %1073 = vmatprep.subr.bf16.mxu1 %v3819_v34 }
  0x80   :  { %760 = vmatmul.mubr.bf16.vlgmr.msra.gmra.mxu0 %v534_v7  ;;  %801 = vmatmul.mubr.bf16.vlgmr.msra.gmra.mxu1 %v534_v7 }
  0x81   :  { %1033 = vmatpush1.bf16.msra.mxu0 %v3821_v36  ;;  %1074 = vmatpush1.bf16.msra.mxu1 %v3823_v37 }
  0x82   :  { %1034 = vmatprep.subr.bf16.mxu0 %v3827_v38  ;;  %1075 = vmatprep.subr.bf16.mxu1 %v3829_v39 }
  0x83   :  { %1064 = vmatprep.mubr.bf16.mxu0 %v4384_v0  ;;  %1105 = vmatprep.mubr.bf16.mxu1 %v4384_v0 }
  0x85   :  { %1035 = vmatpush1.bf16.msra.mxu0 %v3831_v40  ;;  %1076 = vmatpush1.bf16.msra.mxu1 %v3835_v41 }
  0x86   :  { %1036 = vmatprep.subr.bf16.mxu0 %v3839_v42  ;;  %1077 = vmatprep.subr.bf16.mxu1 %v3841_v43 }
  0x89   :  { %1037 = vmatpush1.bf16.msra.mxu0 %v3845_v45  ;;  %1078 = vmatpush1.bf16.msra.mxu1 %v3847_v46 }
  0x8a   :  { %1038 = vmatprep.subr.bf16.mxu0 %v3851_v47  ;;  %1079 = vmatprep.subr.bf16.mxu1 %v3855_v48 }
  0x8d   :  { %1039 = vmatpush1.bf16.msra.mxu0 %v3857_v49  ;;  %1080 = vmatpush1.bf16.msra.mxu1 %v3859_v50 }
  0x8e   :  { %1040 = vmatprep.subr.bf16.mxu0 %v3863_v51  ;;  %1081 = vmatprep.subr.bf16.mxu1 %v3867_v52 }
  0x91   :  { %1041 = vmatpush1.bf16.msra.mxu0 %v3871_v54  ;;  %1082 = vmatpush1.bf16.msra.mxu1 %v3873_v55 }
  0x92   :  { %1042 = vmatprep.subr.bf16.mxu0 %v3875_v56  ;;  %1083 = vmatprep.subr.bf16.mxu1 %v3877_v57 }
  0x95   :  { %1043 = vmatpush1.bf16.msra.mxu0 %v3883_v58  ;;  %1084 = vmatpush1.bf16.msra.mxu1 %v3885_v59 }
  0x96   :  { %1044 = vmatprep.subr.bf16.mxu0 %v3887_v60  ;;  %1085 = vmatprep.subr.bf16.mxu1 %v3889_v61 }
  0x99   :  { %1045 = vmatpush1.bf16.msra.mxu0 %v3897_v63  ;;  %1086 = vmatpush1.bf16.msra.mxu1 %v3899_v1 }
  0x9a   :  { %1046 = vmatprep.subr.bf16.mxu0 %v3901_v2  ;;  %1087 = vmatprep.subr.bf16.mxu1 %v3903_v3 }
  0x9d   :  { %1047 = vmatpush1.bf16.msra.mxu0 %v3911_v4  ;;  %1088 = vmatpush1.bf16.msra.mxu1 %v3913_v5 }
  0x9e   :  { %1338 = vmatprep.subr.bf16.mxu0 %v3817_v33  ;;  %1379 = vmatprep.subr.bf16.mxu1 %v3819_v34 }
 0x120   :  { %v3957_v14 = vpop.f32.mrf.mxu0  ;;  %v3959_v15 = vpop.f32.mrf.mxu1 }
 0x122   :  { %v3963_v18 = vpop.f32.mrf.mxu0  ;;  %v3965_v19 = vpop.f32.mrf.mxu1 }
 0x124   :  { %v385_v22 = vpop.f32.mrf.mxu0  ;;  %v458_v23 = vpop.f32.mrf.mxu1 }
 0x125   :  { %v3969_v25 = vadd.f32 %v385_v22, %v146_v20  ;;  %v3972_v26 = vadd.f32 %v458_v23, %v3961_v16 }
 0x126   :  { %v387_v27 = vpop.f32.mrf.mxu0  ;;  %v460_v28 = vpop.f32.mrf.mxu1 }
 0x127   :  { %v3974_v29 = vadd.f32 %v387_v27, %v150_v24  ;;  %v3977_v30 = vadd.f32 %v460_v28, %v3967_v21 }
 0x128   :  { %v391_v31 = vpop.f32.mrf.mxu0  ;;  %v464_v32 = vpop.f32.mrf.mxu1 }
 0x129   :  { %v3979_v35 = vadd.f32 %v391_v31, %v146_v20  ;;  %v3982_v44 = vadd.f32 %v464_v32, %v3961_v16 }
 0x12a   :  { %v393_v53 = vpop.f32.mrf.mxu0  ;;  %v466_v62 = vpop.f32.mrf.mxu1 }
 0x12b   :  { %v3984_v6 = vadd.f32 %v393_v53, %v150_v24  ;;  %v3987_v7 = vadd.f32 %v466_v62, %v3967_v21 }
 0x12c   :  { %v395_v8 = vpop.f32.mrf.mxu0  ;;  %v468_v9 = vpop.f32.mrf.mxu1 }
 0x12d   :  { %v3989_v10 = vadd.f32 %v395_v8, %v146_v20  ;;  %v3992_v11 = vadd.f32 %v468_v9, %v3961_v16 }
 0x12e   :  { %v397_v12 = vpop.f32.mrf.mxu0  ;;  %v470_v13 = vpop.f32.mrf.mxu1 }
 0x12f   :  { %4386 = vst [vmem:[#allocation21_spill] sm:$0xff] %v3989_v10  ;;  %4387 = vst [vmem:[#allocation22_spill] sm:$0xff] %v3992_v11  ;;  %v3994_v17 = vadd.f32 %v397_v12, %v150_v24  ;;  %v3997_v22 = vadd.f32 %v470_v13, %v3967_v21  ;;  %v455_v10 = vadd.f32 %v3959_v15, %v3961_v16  ;;  %v99_v15 = vld [vmem:[%s4380_s5] sm:$0xff]  ;;  %s3744_s5 = smov [#allocation13]  }
 0x130   :  { %v401_v23 = vpop.f32.mrf.mxu0  ;;  %v474_v27 = vpop.f32.mrf.mxu1  ;;  %s2994_s30 = sshll.u32 %s3744_s5, 4  ;;  %s2995_s30 = int_to_ptr.vmem [resolvable:$true] %s2994_s30 }
 0x131   :  { %4388 = vst [vmem:[#allocation23_spill] sm:$0xff] %v3994_v17  ;;  %4389 = vst [vmem:[#allocation24_spill] sm:$0xff] %v3997_v22  ;;  %v3999_v28 = vadd.f32 %v401_v23, %v146_v20  ;;  %v4002_v31 = vadd.f32 %v474_v27, %v3961_v16  ;;  %s3664_s14 = scalar_lea.vmem %s2995_s30, 128  ;;  %p3669_p12 = scmp.lt.s32.totalorder %s2995_s30, %s2995_s30 }
 0x132   :  { %v403_v32 = vpop.f32.mrf.mxu0  ;;  %v476_v53 = vpop.f32.mrf.mxu1  ;;  %p3665_p11 = scmp.ne.s32.totalorder %s2995_s30, %s3664_s14  ;;  %p3670_p13 = scmp.lt.s32.totalorder %s3664_s14, %s3664_s14 }
 0x133   :  { %4390 = vst [vmem:[#allocation25_spill] sm:$0xff] %v3999_v28  ;;  %4391 = vst [vmem:[#allocation26_spill] sm:$0xff] %v4002_v31  ;;  %v4004_v62 = vadd.f32 %v403_v32, %v150_v24  ;;  %v4007_v8 = vadd.f32 %v476_v53, %v3967_v21 }
 0x134   :  { %v405_v9 = vpop.f32.mrf.mxu0  ;;  %v478_v12 = vpop.f32.mrf.mxu1  ;;  %p3671_p0 = por %p3670_p13, %p3669_p12 }
 0x135   :  { %4392 = vst [vmem:[#allocation27_spill] sm:$0xff] %v4004_v62  ;;  %4393 = vst [vmem:[#allocation28_spill] sm:$0xff] %v4007_v8  ;;  %v4009_v0 = vadd.f32 %v405_v9, %v146_v20  ;;  %v4012_v13 = vadd.f32 %v478_v12, %v3961_v16 }
 0x136   :  { %v407_v22 = vpop.f32.mrf.mxu0  ;;  %v480_v23 = vpop.f32.mrf.mxu1  ;;  %p3672_p1 = pnand %p3671_p0, %p3665_p11 }
 0x137   :  { %4394 = vst [vmem:[#allocation29_spill] sm:$0xff] %v4009_v0  ;;  %4395 = vst [vmem:[#allocation30_spill] sm:$0xff] %v4012_v13  ;;  %v4014_v28 = vadd.f32 %v407_v22, %v150_v24  ;;  %v4017_v27 = vadd.f32 %v480_v23, %v3967_v21 }
 0x138   :  { %v411_v31 = vpop.f32.mrf.mxu0  ;;  %v484_v32 = vpop.f32.mrf.mxu1 }
 0x139   :  { %4396 = vst [vmem:[#allocation31_spill] sm:$0xff] %v4014_v28  ;;  %4397 = vst [vmem:[#allocation32_spill] sm:$0xff] %v4017_v27  ;;  %v4019_v62 = vadd.f32 %v411_v31, %v146_v20  ;;  %v4022_v53 = vadd.f32 %v484_v32, %v3961_v16 }
 0x13a   :  { %v413_v8 = vpop.f32.mrf.mxu0  ;;  %v486_v9 = vpop.f32.mrf.mxu1 }
 0x13b   :  { %4398 = vst [vmem:[#allocation33_spill] sm:$0xff] %v4019_v62  ;;  %4399 = vst [vmem:[#allocation34_spill] sm:$0xff] %v4022_v53  ;;  %v4024_v0 = vadd.f32 %v413_v8, %v150_v24  ;;  %v4027_v12 = vadd.f32 %v486_v9, %v3967_v21  ;;  %v382_v62 = vadd.f32 %v3957_v14, %v146_v20 }
 0x13c   :  { %v415_v13 = vpop.f32.mrf.mxu0  ;;  %v488_v22 = vpop.f32.mrf.mxu1  ;;  %v384_v9 = vadd.f32 %v3963_v18, %v150_v24 }
 0x13d   :  { %4400 = vst [vmem:[#allocation35_spill] sm:$0xff] %v4024_v0  ;;  %4401 = vst [vmem:[#allocation36_spill] sm:$0xff] %v4027_v12  ;;  %v4029_v28 = vadd.f32 %v415_v13, %v146_v20  ;;  %v4032_v23 = vadd.f32 %v488_v22, %v3961_v16 }
 0x13e   :  { %v417_v27 = vpop.f32.mrf.mxu0  ;;  %v490_v31 = vpop.f32.mrf.mxu1 }
 0x13f   :  { %4402 = vst [vmem:[#allocation37_spill] sm:$0xff] %v4029_v28  ;;  %4403 = vst [vmem:[#allocation38_spill] sm:$0xff] %v4032_v23  ;;  %v4035_v32 = vadd.f32 %v417_v27, %v150_v24  ;;  %v4038_v53 = vadd.f32 %v490_v31, %v3967_v21 }
 0x140   :  { %v761_v8 = vpop.f32.mrf.mxu0  ;;  %v802_v0 = vpop.f32.mrf.mxu1 }
 0x141   :  { %4404 = vst [vmem:[#allocation39_spill] sm:$0xff] %v4038_v53  ;;  %v809_v12 = vadd.f32 %v761_v8, %v382_v62  ;;  %v811_v31 = vadd.f32 %v802_v0, %v455_v10  ;;  %v457_v53 = vadd.f32 %v3965_v19, %v3967_v21 }
 0x142   :  { %v763_v11 = vpop.f32.mrf.mxu0  ;;  %v804_v13 = vpop.f32.mrf.mxu1 }
 0x143   :  { %v813_v28 = vmul.f32 0.5, %v809_v12  ;;  %v810_v17 = vadd.f32 %v763_v11, %v384_v9  ;;  %v812_v18 = vadd.f32 %v804_v13, %v457_v53 }
 0x144   :  { %v765_v22 = vpop.f32.mrf.mxu0  ;;  %v806_v23 = vpop.f32.mrf.mxu1 }
 0x145   :  { %3484 = vtanh.f32 %v813_v28  ;;  %v817_v14 = vmul.f32 0.5, %v810_v17  ;;  %v822_v24 = vmul.f32 0.5, %v812_v18 }
 0x146   :  { %v766_v20 = vpop.f32.mrf.mxu0  ;;  %v807_v27 = vpop.f32.mrf.mxu1 }
 0x147   :  { %3486 = vtanh.f32 %v817_v14  ;;  %v4405_v14 = vmov 0  }
 0x148   :  { %3488 = vtanh.f32 %v811_v31 }
 0x149   :  { %3490 = vtanh.f32 %v822_v24 }
 0x152   :  { %v3485_v62 = vpop.eup %3484 }
 0x153   :  { %v815_v12 = vmul.f32 0.5, %v3485_v62 }
 0x154   :  { %v3487_v11 = vpop.eup %3486 }
 0x155   :  { %v816_v8 = vadd.f32 0.5, %v815_v12  ;;  %v819_v23 = vmul.f32 0.5, %v3487_v11  ;;  %v3489_v17 = vpop.eup %3488 }
 0x156   :  { %v3491_v19 = vpop.eup %3490 }
 0x157   :  { %v820_v16 = vadd.f32 0.5, %v819_v23  ;;  %v827_v10 = vmul.f32 %v3489_v17, %v816_v8  ;;  %v824_v21 = vmul.f32 0.5, %v3491_v19 }
 0x159   :  { %v826_v0 = vmul.f32 %v820_v16, %v99_v15  ;;  %v825_v53 = vadd.f32 0.5, %v824_v21 }
 0x15b   :  { %v4048_v28 = vadd.f32 %v827_v10, %v826_v0 }
 0x15d   :  { %3492 = vtanh.f32 %v4048_v28 }
 0x16a   :  { %v3493_v9 = vpop.eup %3492 }
 0x16b   :  { %v830_v13 = vmul.f32 %v3493_v9, %v825_v53 }
 0x16d   :  { %831 = vst [vmem:[#allocation12] sm:$0xff] %v830_v13  ;;  %v839_v22 = vpack.c.bf16 %v830_v13, %v830_v13 }
 0x16f   :  { %1065 = vmatmul.mubr.bf16.vlgmr.msra.gmra.mxu0 %v839_v22  ;;  %1106 = vmatmul.mubr.bf16.vlgmr.msra.gmra.mxu1 %v839_v22 }
 0x170   :  { %1339 = vmatpush1.bf16.msra.mxu0 %v3821_v36  ;;  %1380 = vmatpush1.bf16.msra.mxu1 %v3823_v37 }
 0x171   :  { %1340 = vmatprep.subr.bf16.mxu0 %v3827_v38  ;;  %1381 = vmatprep.subr.bf16.mxu1 %v3829_v39 }
 0x172   :  { %1370 = vmatprep.mubr.bf16.mxu0 %v4405_v14  ;;  %1411 = vmatprep.mubr.bf16.mxu1 %v4405_v14 }
 0x174   :  { %1341 = vmatpush1.bf16.msra.mxu0 %v3831_v40  ;;  %1382 = vmatpush1.bf16.msra.mxu1 %v3835_v41 }
 0x175   :  { %1342 = vmatprep.subr.bf16.mxu0 %v3839_v42  ;;  %1383 = vmatprep.subr.bf16.mxu1 %v3841_v43 }
 0x178   :  { %1343 = vmatpush1.bf16.msra.mxu0 %v3845_v45  ;;  %1384 = vmatpush1.bf16.msra.mxu1 %v3847_v46 }
 0x179   :  { %1344 = vmatprep.subr.bf16.mxu0 %v3851_v47  ;;  %1385 = vmatprep.subr.bf16.mxu1 %v3855_v48 }
 0x17c   :  { %1345 = vmatpush1.bf16.msra.mxu0 %v3857_v49  ;;  %1386 = vmatpush1.bf16.msra.mxu1 %v3859_v50 }
 0x17d   :  { %1346 = vmatprep.subr.bf16.mxu0 %v3863_v51  ;;  %1387 = vmatprep.subr.bf16.mxu1 %v3867_v52 }
 0x180   :  { %1347 = vmatpush1.bf16.msra.mxu0 %v3871_v54  ;;  %1388 = vmatpush1.bf16.msra.mxu1 %v3873_v55 }
 0x181   :  { %1348 = vmatprep.subr.bf16.mxu0 %v3875_v56  ;;  %1389 = vmatprep.subr.bf16.mxu1 %v3877_v57 }
 0x184   :  { %1349 = vmatpush1.bf16.msra.mxu0 %v3883_v58  ;;  %1390 = vmatpush1.bf16.msra.mxu1 %v3885_v59 }
 0x185   :  { %1350 = vmatprep.subr.bf16.mxu0 %v3887_v60  ;;  %1391 = vmatprep.subr.bf16.mxu1 %v3889_v61 }
 0x188   :  { %1351 = vmatpush1.bf16.msra.mxu0 %v3897_v63  ;;  %1392 = vmatpush1.bf16.msra.mxu1 %v3899_v1 }
 0x189   :  { %1352 = vmatprep.subr.bf16.mxu0 %v3901_v2  ;;  %1393 = vmatprep.subr.bf16.mxu1 %v3903_v3 }
 0x18c   :  { %1353 = vmatpush1.bf16.msra.mxu0 %v3911_v4  ;;  %1394 = vmatpush1.bf16.msra.mxu1 %v3913_v5 }
 0x18d   :  { %1644 = vmatprep.subr.bf16.mxu0 %v3817_v33  ;;  %1685 = vmatprep.subr.bf16.mxu1 %v3819_v34 }
 0x22f   :  { %v1066_v20 = vpop.f32.mrf.mxu0  ;;  %v1107_v27 = vpop.f32.mrf.mxu1 }
 0x230   :  { %v1114_v31 = vadd.f32 %v1066_v20, %v3969_v25  ;;  %v1116_v23 = vadd.f32 %v1107_v27, %v3972_v26 }
 0x231   :  { %v1068_v18 = vpop.f32.mrf.mxu0  ;;  %v1109_v24 = vpop.f32.mrf.mxu1 }
 0x232   :  { %v1118_v62 = vmul.f32 0.5, %v1114_v31  ;;  %v1115_v12 = vadd.f32 %v1068_v18, %v3974_v29  ;;  %v1117_v33 = vadd.f32 %v1109_v24, %v3977_v30  ;;  %v4147_v24 = vld [vmem:[#allocation8 + $0xc4] ss:$16 sps:$4 sm:$0xff]  }
 0x233   :  { %v1070_v11 = vpop.f32.mrf.mxu0  ;;  %v1111_v8 = vpop.f32.mrf.mxu1 }
 0x234   :  { %3494 = vtanh.f32 %v1118_v62  ;;  %v1122_v15 = vmul.f32 0.5, %v1115_v12  ;;  %v1127_v34 = vmul.f32 0.5, %v1117_v33  ;;  %v4149_v62 = vld [vmem:[#allocation8 + $0xcc] ss:$16 sps:$4 sm:$0xff]   ;;  %v4151_v12 = vld [vmem:[#allocation8 + $0xc0] ss:$16 sps:$4 sm:$0xff]  }
 0x235   :  { %v1071_v16 = vpop.f32.mrf.mxu0  ;;  %v1112_v17 = vpop.f32.mrf.mxu1  ;;  %v4153_v11 = vld [vmem:[#allocation8 + $0xc8] ss:$16 sps:$4 sm:$0xff]   ;;  %v4159_v8 = vld [vmem:[#allocation8 + $0xa4] ss:$16 sps:$4 sm:$0xff]   ;;  %v4173_v33 = vld [vmem:[#allocation8 + $0x8c] ss:$16 sps:$4 sm:$0xff]  }
 0x236   :  { %3496 = vtanh.f32 %v1122_v15  ;;  %v4163_v15 = vld [vmem:[#allocation8 + $0xa0] ss:$16 sps:$4 sm:$0xff]   ;;  %v4165_v16 = vld [vmem:[#allocation8 + $0xa8] ss:$16 sps:$4 sm:$0xff]   ;;  %v4171_v17 = vld [vmem:[#allocation8 + $0x84] ss:$16 sps:$4 sm:$0xff]  }
 0x237   :  { %3498 = vtanh.f32 %v1116_v23  ;;  %v4161_v23 = vld [vmem:[#allocation8 + $0xac] ss:$16 sps:$4 sm:$0xff]  }
 0x238   :  { %3500 = vtanh.f32 %v1127_v34  ;;  %v4175_v34 = vld [vmem:[#allocation8 + $0x80] ss:$16 sps:$4 sm:$0xff]  }
 0x241   :  { %v3495_v0 = vpop.eup %3494 }
 0x242   :  { %v1120_v25 = vmul.f32 0.5, %v3495_v0  ;;  %v4177_v0 = vld [vmem:[#allocation8 + $0x88] ss:$16 sps:$4 sm:$0xff]  }
 0x243   :  { %v3497_v10 = vpop.eup %3496 }
 0x244   :  { %v1121_v19 = vadd.f32 0.5, %v1120_v25  ;;  %v1124_v21 = vmul.f32 0.5, %v3497_v10  ;;  %v3499_v29 = vpop.eup %3498  ;;  %v4183_v25 = vld [vmem:[#allocation8 + $0x64] ss:$16 sps:$4 sm:$0xff]   ;;  %v4185_v10 = vld [vmem:[#allocation8 + $0x6c] ss:$16 sps:$4 sm:$0xff]  }
 0x245   :  { %v3501_v22 = vpop.eup %3500 }
 0x246   :  { %v1125_v53 = vadd.f32 0.5, %v1124_v21  ;;  %v1132_v9 = vmul.f32 %v3499_v29, %v1121_v19  ;;  %v1129_v20 = vmul.f32 0.5, %v3501_v22  ;;  %v4187_v19 = vld [vmem:[#allocation8 + $0x60] ss:$16 sps:$4 sm:$0xff]   ;;  %v4189_v21 = vld [vmem:[#allocation8 + $0x68] ss:$16 sps:$4 sm:$0xff]  }
 0x247   :  { %v4195_v29 = vld [vmem:[#allocation8 + $0x44] ss:$16 sps:$4 sm:$0xff]   ;;  %v4209_v22 = vld [vmem:[#allocation8 + $0x2c] ss:$16 sps:$4 sm:$0xff]  }
 0x248   :  { %v1131_v13 = vmul.f32 %v1125_v53, %v4048_v28  ;;  %v1130_v27 = vadd.f32 0.5, %v1129_v20  ;;  %v4141_v28 = vld [vmem:[#allocation8 + $0xe8] ss:$16 sps:$4 sm:$0xff]   ;;  %v4197_v53 = vld [vmem:[#allocation8 + $0x4c] ss:$16 sps:$4 sm:$0xff]  }
 0x249   :  { %v4211_v20 = vld [vmem:[#allocation8 + $0x20] ss:$16 sps:$4 sm:$0xff]  }
 0x24a   :  { %v4090_v26 = vadd.f32 %v1132_v9, %v1131_v13  ;;  %v4199_v9 = vld [vmem:[#allocation8 + $0x40] ss:$16 sps:$4 sm:$0xff]   ;;  %v4201_v13 = vld [vmem:[#allocation8 + $0x48] ss:$16 sps:$4 sm:$0xff]  }
 0x24c   :  { %3502 = vtanh.f32 %v4090_v26 }
 0x259   :  { %v3503_v30 = vpop.eup %3502 }
 0x25a   :  { %v1135_v31 = vmul.f32 %v3503_v30, %v1130_v27  ;;  %v4213_v27 = vld [vmem:[#allocation8 + $0x28] ss:$16 sps:$4 sm:$0xff]   ;;  %v4219_v30 = vld [vmem:[#allocation8 + $0x4] ss:$16 sps:$4 sm:$0xff]  }
 0x25c   :  { %1137 = vst [vmem:[#allocation12 + $0x8] sm:$0xff] %v1135_v31  ;;  %v1145_v18 = vpack.c.bf16 %v1135_v31, %v1135_v31  ;;  %v4221_v31 = vld [vmem:[#allocation8 + $0xc] ss:$16 sps:$4 sm:$0xff]  }
 0x25e   :  { %1371 = vmatmul.mubr.bf16.vlgmr.msra.gmra.mxu0 %v1145_v18  ;;  %1412 = vmatmul.mubr.bf16.vlgmr.msra.gmra.mxu1 %v1145_v18  ;;  %v4223_v18 = vld [vmem:[#allocation8] ss:$16 sps:$4 sm:$0xff]  }
 0x25f   :  { %1645 = vmatpush1.bf16.msra.mxu0 %v3821_v36  ;;  %1686 = vmatpush1.bf16.msra.mxu1 %v3823_v37 }
 0x260   :  { %1646 = vmatprep.subr.bf16.mxu0 %v3827_v38  ;;  %1687 = vmatprep.subr.bf16.mxu1 %v3829_v39 }
 0x261   :  { %1676 = vmatprep.mubr.bf16.mxu0 %v4405_v14  ;;  %1717 = vmatprep.mubr.bf16.mxu1 %v4405_v14 }
 0x263   :  { %1647 = vmatpush1.bf16.msra.mxu0 %v3831_v40  ;;  %1688 = vmatpush1.bf16.msra.mxu1 %v3835_v41 }
 0x264   :  { %1648 = vmatprep.subr.bf16.mxu0 %v3839_v42  ;;  %1689 = vmatprep.subr.bf16.mxu1 %v3841_v43 }
 0x267   :  { %1649 = vmatpush1.bf16.msra.mxu0 %v3845_v45  ;;  %1690 = vmatpush1.bf16.msra.mxu1 %v3847_v46 }
 0x268   :  { %1650 = vmatprep.subr.bf16.mxu0 %v3851_v47  ;;  %1691 = vmatprep.subr.bf16.mxu1 %v3855_v48 }
 0x26b   :  { %1651 = vmatpush1.bf16.msra.mxu0 %v3857_v49  ;;  %1692 = vmatpush1.bf16.msra.mxu1 %v3859_v50 }
 0x26c   :  { %1652 = vmatprep.subr.bf16.mxu0 %v3863_v51  ;;  %1693 = vmatprep.subr.bf16.mxu1 %v3867_v52 }
 0x26f   :  { %1653 = vmatpush1.bf16.msra.mxu0 %v3871_v54  ;;  %1694 = vmatpush1.bf16.msra.mxu1 %v3873_v55 }
 0x270   :  { %1654 = vmatprep.subr.bf16.mxu0 %v3875_v56  ;;  %1695 = vmatprep.subr.bf16.mxu1 %v3877_v57 }
 0x273   :  { %1655 = vmatpush1.bf16.msra.mxu0 %v3883_v58  ;;  %1696 = vmatpush1.bf16.msra.mxu1 %v3885_v59 }
 0x274   :  { %1656 = vmatprep.subr.bf16.mxu0 %v3887_v60  ;;  %1697 = vmatprep.subr.bf16.mxu1 %v3889_v61 }
 0x277   :  { %1657 = vmatpush1.bf16.msra.mxu0 %v3897_v63  ;;  %1698 = vmatpush1.bf16.msra.mxu1 %v3899_v1 }
 0x278   :  { %1658 = vmatprep.subr.bf16.mxu0 %v3901_v2  ;;  %1699 = vmatprep.subr.bf16.mxu1 %v3903_v3 }
 0x27b   :  { %1659 = vmatpush1.bf16.msra.mxu0 %v3911_v4  ;;  %1700 = vmatpush1.bf16.msra.mxu1 %v3913_v5 }
 0x31e   :  { %v1372_v36 = vpop.f32.mrf.mxu0  ;;  %v1413_v37 = vpop.f32.mrf.mxu1 }
 0x31f   :  { %v1420_v38 = vadd.f32 %v1372_v36, %v3979_v35  ;;  %v1422_v46 = vadd.f32 %v1413_v37, %v3982_v44  ;;  %v4135_v44 = vld [vmem:[#allocation8 + $0xe4] ss:$16 sps:$4 sm:$0xff]   ;;  %v4225_v36 = vld [vmem:[#allocation8 + $0x8] ss:$16 sps:$4 sm:$0xff]  }
 0x320   :  { %v1374_v39 = vpop.f32.mrf.mxu0  ;;  %v1415_v40 = vpop.f32.mrf.mxu1  ;;  %1950 = vmatprep.subr.bf16.mxu0 %v4135_v44 }
 0x321   :  { %v1424_v41 = vmul.f32 0.5, %v1420_v38  ;;  %v1421_v42 = vadd.f32 %v1374_v39, %v3984_v6  ;;  %v1423_v50 = vadd.f32 %v1415_v40, %v3987_v7  ;;  %v4137_v6 = vld [vmem:[#allocation8 + $0xec] ss:$16 sps:$4 sm:$0xff]   ;;  %v4139_v7 = vld [vmem:[#allocation8 + $0xe0] ss:$16 sps:$4 sm:$0xff]  }
 0x322   :  { %v1376_v43 = vpop.f32.mrf.mxu0  ;;  %v1417_v45 = vpop.f32.mrf.mxu1  ;;  %1991 = vmatprep.subr.bf16.mxu1 %v4137_v6  ;;  %v4406_v39 = vld [vmem:[#allocation21_spill] sm:$0xff] }
 0x323   :  { %3504 = vtanh.f32 %v1424_v41  ;;  %v1428_v47 = vmul.f32 0.5, %v1421_v42  ;;  %v1433_v51 = vmul.f32 0.5, %v1423_v50  ;;  %v4407_v45 = vld [vmem:[#allocation23_spill] sm:$0xff] }
 0x324   :  { %v1377_v48 = vpop.f32.mrf.mxu0  ;;  %v1418_v49 = vpop.f32.mrf.mxu1 }
 0x325   :  { %3506 = vtanh.f32 %v1428_v47  ;;  %v4408_v49 = vld [vmem:[#allocation22_spill] sm:$0xff] }
 0x326   :  { %3508 = vtanh.f32 %v1422_v46 }
 0x327   :  { %3510 = vtanh.f32 %v1433_v51 }
 0x330   :  { %v3505_v52 = vpop.eup %3504 }
 0x331   :  { %v1426_v54 = vmul.f32 0.5, %v3505_v52 }
 0x332   :  { %v3507_v55 = vpop.eup %3506 }
 0x333   :  { %v1427_v56 = vadd.f32 0.5, %v1426_v54  ;;  %v1430_v57 = vmul.f32 0.5, %v3507_v55  ;;  %v3509_v58 = vpop.eup %3508  ;;  %v4409_v55 = vld [vmem:[#allocation24_spill] sm:$0xff] }
 0x334   :  { %v3511_v1 = vpop.eup %3510 }
 0x335   :  { %v1431_v59 = vadd.f32 0.5, %v1430_v57  ;;  %v1438_v60 = vmul.f32 %v3509_v58, %v1427_v56  ;;  %v1435_v2 = vmul.f32 0.5, %v3511_v1 }
 0x337   :  { %v1437_v61 = vmul.f32 %v1431_v59, %v4090_v26  ;;  %v1436_v3 = vadd.f32 0.5, %v1435_v2  ;;  %v4207_v26 = vld [vmem:[#allocation8 + $0x24] ss:$16 sps:$4 sm:$0xff]  }
 0x339   :  { %v4130_v63 = vadd.f32 %v1438_v60, %v1437_v61 }
 0x33b   :  { %3512 = vtanh.f32 %v4130_v63 }
 0x348   :  { %v3513_v4 = vpop.eup %3512 }
 0x349   :  { %v1441_v5 = vmul.f32 %v3513_v4, %v1436_v3 }
 0x34b   :  { %1443 = vst [vmem:[#allocation12 + $0x10] sm:$0xff] %v1441_v5  ;;  %v1451_v35 = vpack.c.bf16 %v1441_v5, %v1441_v5 }
 0x34d   :  { %1677 = vmatmul.mubr.bf16.vlgmr.msra.gmra.mxu0 %v1451_v35  ;;  %1718 = vmatmul.mubr.bf16.vlgmr.msra.gmra.mxu1 %v1451_v35 }
 0x34e   :  { %1982 = vmatprep.mubr.bf16.mxu0 %v4405_v14  ;;  %2023 = vmatprep.mubr.bf16.mxu1 %v4405_v14 }
 0x34f   :  { %1951 = vmatpush1.bf16.msra.mxu0 %v4139_v7  ;;  %1992 = vmatpush1.bf16.msra.mxu1 %v4141_v28 }
 0x350   :  { %1952 = vmatprep.subr.bf16.mxu0 %v4147_v24  ;;  %1993 = vmatprep.subr.bf16.mxu1 %v4149_v62 }
 0x353   :  { %1953 = vmatpush1.bf16.msra.mxu0 %v4151_v12  ;;  %1994 = vmatpush1.bf16.msra.mxu1 %v4153_v11 }
 0x354   :  { %1954 = vmatprep.subr.bf16.mxu0 %v4159_v8  ;;  %1995 = vmatprep.subr.bf16.mxu1 %v4161_v23 }
 0x357   :  { %1955 = vmatpush1.bf16.msra.mxu0 %v4163_v15  ;;  %1996 = vmatpush1.bf16.msra.mxu1 %v4165_v16 }
 0x358   :  { %1956 = vmatprep.subr.bf16.mxu0 %v4171_v17  ;;  %1997 = vmatprep.subr.bf16.mxu1 %v4173_v33 }
 0x35b   :  { %1957 = vmatpush1.bf16.msra.mxu0 %v4175_v34  ;;  %1998 = vmatpush1.bf16.msra.mxu1 %v4177_v0 }
 0x35c   :  { %1958 = vmatprep.subr.bf16.mxu0 %v4183_v25  ;;  %1999 = vmatprep.subr.bf16.mxu1 %v4185_v10 }
 0x35f   :  { %1959 = vmatpush1.bf16.msra.mxu0 %v4187_v19  ;;  %2000 = vmatpush1.bf16.msra.mxu1 %v4189_v21 }
 0x360   :  { %1960 = vmatprep.subr.bf16.mxu0 %v4195_v29  ;;  %2001 = vmatprep.subr.bf16.mxu1 %v4197_v53 }
 0x363   :  { %1961 = vmatpush1.bf16.msra.mxu0 %v4199_v9  ;;  %2002 = vmatpush1.bf16.msra.mxu1 %v4201_v13 }
 0x364   :  { %1962 = vmatprep.subr.bf16.mxu0 %v4207_v26  ;;  %2003 = vmatprep.subr.bf16.mxu1 %v4209_v22 }
 0x367   :  { %1963 = vmatpush1.bf16.msra.mxu0 %v4211_v20  ;;  %2004 = vmatpush1.bf16.msra.mxu1 %v4213_v27 }
 0x368   :  { %1964 = vmatprep.subr.bf16.mxu0 %v4219_v30  ;;  %2005 = vmatprep.subr.bf16.mxu1 %v4221_v31 }
 0x36b   :  { %1965 = vmatpush1.bf16.msra.mxu0 %v4223_v18  ;;  %2006 = vmatpush1.bf16.msra.mxu1 %v4225_v36 }
 0x36c   :  { %2256 = vmatprep.subr.bf16.mxu0 %v4135_v44  ;;  %2297 = vmatprep.subr.bf16.mxu1 %v4137_v6 }
 0x40d   :  { %v1678_v37 = vpop.f32.mrf.mxu0  ;;  %v1719_v38 = vpop.f32.mrf.mxu1 }
 0x40e   :  { %v1726_v40 = vadd.f32 %v1678_v37, %v4406_v39  ;;  %v1728_v50 = vadd.f32 %v1719_v38, %v4408_v49 }
 0x40f   :  { %v1680_v41 = vpop.f32.mrf.mxu0  ;;  %v1721_v42 = vpop.f32.mrf.mxu1 }
 0x410   :  { %v1730_v43 = vmul.f32 0.5, %v1726_v40  ;;  %v1727_v46 = vadd.f32 %v1680_v41, %v4407_v45  ;;  %v1729_v56 = vadd.f32 %v1721_v42, %v4409_v55  ;;  %v4410_v45 = vld [vmem:[#allocation25_spill] sm:$0xff]  ;;  %v4412_v55 = vld [vmem:[#allocation26_spill] sm:$0xff] }
 0x411   :  { %v1682_v47 = vpop.f32.mrf.mxu0  ;;  %v1723_v48 = vpop.f32.mrf.mxu1 }
 0x412   :  { %3514 = vtanh.f32 %v1730_v43  ;;  %v1734_v51 = vmul.f32 0.5, %v1727_v46  ;;  %v1739_v57 = vmul.f32 0.5, %v1729_v56 }
 0x413   :  { %v1683_v52 = vpop.f32.mrf.mxu0  ;;  %v1724_v54 = vpop.f32.mrf.mxu1 }
 0x414   :  { %3516 = vtanh.f32 %v1734_v51 }
 0x415   :  { %3518 = vtanh.f32 %v1728_v50  ;;  %v4411_v50 = vld [vmem:[#allocation27_spill] sm:$0xff] }
 0x416   :  { %3520 = vtanh.f32 %v1739_v57 }
 0x41f   :  { %v3515_v58 = vpop.eup %3514 }
 0x420   :  { %v1732_v59 = vmul.f32 0.5, %v3515_v58 }
 0x421   :  { %v3517_v60 = vpop.eup %3516 }
 0x422   :  { %v1733_v61 = vadd.f32 0.5, %v1732_v59  ;;  %v1736_v1 = vmul.f32 0.5, %v3517_v60  ;;  %v3519_v2 = vpop.eup %3518  ;;  %v4413_v60 = vld [vmem:[#allocation28_spill] sm:$0xff] }
 0x423   :  { %v3521_v37 = vpop.eup %3520 }
 0x424   :  { %v1737_v3 = vadd.f32 0.5, %v1736_v1  ;;  %v1744_v4 = vmul.f32 %v3519_v2, %v1733_v61  ;;  %v1741_v38 = vmul.f32 0.5, %v3521_v37 }
 0x426   :  { %v1743_v5 = vmul.f32 %v1737_v3, %v4130_v63  ;;  %v1742_v39 = vadd.f32 0.5, %v1741_v38 }
 0x428   :  { %v4238_v35 = vadd.f32 %v1744_v4, %v1743_v5 }
 0x42a   :  { %3522 = vtanh.f32 %v4238_v35 }
 0x437   :  { %v3523_v40 = vpop.eup %3522 }
 0x438   :  { %v1747_v41 = vmul.f32 %v3523_v40, %v1742_v39 }
 0x43a   :  { %1749 = vst [vmem:[#allocation12 + $0x18] sm:$0xff] %v1747_v41  ;;  %v1757_v42 = vpack.c.bf16 %v1747_v41, %v1747_v41 }
 0x43c   :  { %1983 = vmatmul.mubr.bf16.vlgmr.msra.gmra.mxu0 %v1757_v42  ;;  %2024 = vmatmul.mubr.bf16.vlgmr.msra.gmra.mxu1 %v1757_v42 }
 0x43d   :  { %2257 = vmatpush1.bf16.msra.mxu0 %v4139_v7  ;;  %2298 = vmatpush1.bf16.msra.mxu1 %v4141_v28 }
 0x43e   :  { %2258 = vmatprep.subr.bf16.mxu0 %v4147_v24  ;;  %2299 = vmatprep.subr.bf16.mxu1 %v4149_v62 }
 0x43f   :  { %2288 = vmatprep.mubr.bf16.mxu0 %v4405_v14  ;;  %2329 = vmatprep.mubr.bf16.mxu1 %v4405_v14 }
 0x441   :  { %2259 = vmatpush1.bf16.msra.mxu0 %v4151_v12  ;;  %2300 = vmatpush1.bf16.msra.mxu1 %v4153_v11 }
 0x442   :  { %2260 = vmatprep.subr.bf16.mxu0 %v4159_v8  ;;  %2301 = vmatprep.subr.bf16.mxu1 %v4161_v23 }
 0x445   :  { %2261 = vmatpush1.bf16.msra.mxu0 %v4163_v15  ;;  %2302 = vmatpush1.bf16.msra.mxu1 %v4165_v16 }
 0x446   :  { %2262 = vmatprep.subr.bf16.mxu0 %v4171_v17  ;;  %2303 = vmatprep.subr.bf16.mxu1 %v4173_v33 }
 0x449   :  { %2263 = vmatpush1.bf16.msra.mxu0 %v4175_v34  ;;  %2304 = vmatpush1.bf16.msra.mxu1 %v4177_v0 }
 0x44a   :  { %2264 = vmatprep.subr.bf16.mxu0 %v4183_v25  ;;  %2305 = vmatprep.subr.bf16.mxu1 %v4185_v10 }
 0x44d   :  { %2265 = vmatpush1.bf16.msra.mxu0 %v4187_v19  ;;  %2306 = vmatpush1.bf16.msra.mxu1 %v4189_v21 }
 0x44e   :  { %2266 = vmatprep.subr.bf16.mxu0 %v4195_v29  ;;  %2307 = vmatprep.subr.bf16.mxu1 %v4197_v53 }
 0x451   :  { %2267 = vmatpush1.bf16.msra.mxu0 %v4199_v9  ;;  %2308 = vmatpush1.bf16.msra.mxu1 %v4201_v13 }
 0x452   :  { %2268 = vmatprep.subr.bf16.mxu0 %v4207_v26  ;;  %2309 = vmatprep.subr.bf16.mxu1 %v4209_v22 }
 0x455   :  { %2269 = vmatpush1.bf16.msra.mxu0 %v4211_v20  ;;  %2310 = vmatpush1.bf16.msra.mxu1 %v4213_v27 }
 0x456   :  { %2270 = vmatprep.subr.bf16.mxu0 %v4219_v30  ;;  %2311 = vmatprep.subr.bf16.mxu1 %v4221_v31 }
 0x459   :  { %2271 = vmatpush1.bf16.msra.mxu0 %v4223_v18  ;;  %2312 = vmatpush1.bf16.msra.mxu1 %v4225_v36 }
 0x45a   :  { %2562 = vmatprep.subr.bf16.mxu0 %v4135_v44  ;;  %2603 = vmatprep.subr.bf16.mxu1 %v4137_v6 }
 0x4fc   :  { %v1984_v63 = vpop.f32.mrf.mxu0  ;;  %v2025_v43 = vpop.f32.mrf.mxu1 }
 0x4fd   :  { %v2032_v46 = vadd.f32 %v1984_v63, %v4410_v45  ;;  %v2034_v56 = vadd.f32 %v2025_v43, %v4412_v55 }
 0x4fe   :  { %v1986_v47 = vpop.f32.mrf.mxu0  ;;  %v2027_v48 = vpop.f32.mrf.mxu1 }
 0x4ff   :  { %v2036_v49 = vmul.f32 0.5, %v2032_v46  ;;  %v2033_v51 = vadd.f32 %v1986_v47, %v4411_v50  ;;  %v2035_v61 = vadd.f32 %v2027_v48, %v4413_v60  ;;  %v4414_v50 = vld [vmem:[#allocation29_spill] sm:$0xff]  ;;  %v4416_v60 = vld [vmem:[#allocation30_spill] sm:$0xff] }
 0x500   :  { %v1988_v52 = vpop.f32.mrf.mxu0  ;;  %v2029_v54 = vpop.f32.mrf.mxu1 }
 0x501   :  { %3524 = vtanh.f32 %v2036_v49  ;;  %v2040_v57 = vmul.f32 0.5, %v2033_v51  ;;  %v2045_v1 = vmul.f32 0.5, %v2035_v61 }
 0x502   :  { %v1989_v58 = vpop.f32.mrf.mxu0  ;;  %v2030_v59 = vpop.f32.mrf.mxu1 }
 0x503   :  { %3526 = vtanh.f32 %v2040_v57 }
 0x504   :  { %3528 = vtanh.f32 %v2034_v56  ;;  %v4415_v56 = vld [vmem:[#allocation31_spill] sm:$0xff] }
 0x505   :  { %3530 = vtanh.f32 %v2045_v1 }
 0x50e   :  { %v3525_v2 = vpop.eup %3524 }
 0x50f   :  { %v2038_v3 = vmul.f32 0.5, %v3525_v2 }
 0x510   :  { %v3527_v4 = vpop.eup %3526 }
 0x511   :  { %v2039_v5 = vadd.f32 0.5, %v2038_v3  ;;  %v2042_v37 = vmul.f32 0.5, %v3527_v4  ;;  %v3529_v38 = vpop.eup %3528 }
 0x512   :  { %v3531_v63 = vpop.eup %3530 }
 0x513   :  { %v2043_v39 = vadd.f32 0.5, %v2042_v37  ;;  %v2050_v40 = vmul.f32 %v3529_v38, %v2039_v5  ;;  %v2047_v43 = vmul.f32 0.5, %v3531_v63 }
 0x515   :  { %v2049_v41 = vmul.f32 %v2043_v39, %v4238_v35  ;;  %v2048_v45 = vadd.f32 0.5, %v2047_v43 }
 0x517   :  { %v4280_v42 = vadd.f32 %v2050_v40, %v2049_v41 }
 0x519   :  { %3532 = vtanh.f32 %v4280_v42 }
 0x526   :  { %v3533_v46 = vpop.eup %3532 }
 0x527   :  { %v2053_v47 = vmul.f32 %v3533_v46, %v2048_v45 }
 0x529   :  { %2055 = vst [vmem:[#allocation12 + $0x20] sm:$0xff] %v2053_v47  ;;  %v2063_v48 = vpack.c.bf16 %v2053_v47, %v2053_v47 }
 0x52b   :  { %2289 = vmatmul.mubr.bf16.vlgmr.msra.gmra.mxu0 %v2063_v48  ;;  %2330 = vmatmul.mubr.bf16.vlgmr.msra.gmra.mxu1 %v2063_v48 }
 0x52c   :  { %2563 = vmatpush1.bf16.msra.mxu0 %v4139_v7  ;;  %2604 = vmatpush1.bf16.msra.mxu1 %v4141_v28 }
 0x52d   :  { %2564 = vmatprep.subr.bf16.mxu0 %v4147_v24  ;;  %2605 = vmatprep.subr.bf16.mxu1 %v4149_v62 }
 0x52e   :  { %2594 = vmatprep.mubr.bf16.mxu0 %v4405_v14  ;;  %2635 = vmatprep.mubr.bf16.mxu1 %v4405_v14 }
 0x530   :  { %2565 = vmatpush1.bf16.msra.mxu0 %v4151_v12  ;;  %2606 = vmatpush1.bf16.msra.mxu1 %v4153_v11 }
 0x531   :  { %2566 = vmatprep.subr.bf16.mxu0 %v4159_v8  ;;  %2607 = vmatprep.subr.bf16.mxu1 %v4161_v23 }
 0x534   :  { %2567 = vmatpush1.bf16.msra.mxu0 %v4163_v15  ;;  %2608 = vmatpush1.bf16.msra.mxu1 %v4165_v16 }
 0x535   :  { %2568 = vmatprep.subr.bf16.mxu0 %v4171_v17  ;;  %2609 = vmatprep.subr.bf16.mxu1 %v4173_v33 }
 0x538   :  { %2569 = vmatpush1.bf16.msra.mxu0 %v4175_v34  ;;  %2610 = vmatpush1.bf16.msra.mxu1 %v4177_v0 }
 0x539   :  { %2570 = vmatprep.subr.bf16.mxu0 %v4183_v25  ;;  %2611 = vmatprep.subr.bf16.mxu1 %v4185_v10 }
 0x53c   :  { %2571 = vmatpush1.bf16.msra.mxu0 %v4187_v19  ;;  %2612 = vmatpush1.bf16.msra.mxu1 %v4189_v21 }
 0x53d   :  { %2572 = vmatprep.subr.bf16.mxu0 %v4195_v29  ;;  %2613 = vmatprep.subr.bf16.mxu1 %v4197_v53 }
 0x540   :  { %2573 = vmatpush1.bf16.msra.mxu0 %v4199_v9  ;;  %2614 = vmatpush1.bf16.msra.mxu1 %v4201_v13 }
 0x541   :  { %2574 = vmatprep.subr.bf16.mxu0 %v4207_v26  ;;  %2615 = vmatprep.subr.bf16.mxu1 %v4209_v22 }
 0x544   :  { %2575 = vmatpush1.bf16.msra.mxu0 %v4211_v20  ;;  %2616 = vmatpush1.bf16.msra.mxu1 %v4213_v27 }
 0x545   :  { %2576 = vmatprep.subr.bf16.mxu0 %v4219_v30  ;;  %2617 = vmatprep.subr.bf16.mxu1 %v4221_v31 }
 0x548   :  { %2577 = vmatpush1.bf16.msra.mxu0 %v4223_v18  ;;  %2618 = vmatpush1.bf16.msra.mxu1 %v4225_v36 }
 0x549   :  { %2868 = vmatprep.subr.bf16.mxu0 %v4135_v44  ;;  %2909 = vmatprep.subr.bf16.mxu1 %v4137_v6  ;;  %v4417_v44 = vld [vmem:[#allocation32_spill] sm:$0xff] }
 0x5eb   :  { %v2290_v35 = vpop.f32.mrf.mxu0  ;;  %v2331_v49 = vpop.f32.mrf.mxu1 }
 0x5ec   :  { %v2338_v51 = vadd.f32 %v2290_v35, %v4414_v50  ;;  %v2340_v61 = vadd.f32 %v2331_v49, %v4416_v60 }
 0x5ed   :  { %v2292_v52 = vpop.f32.mrf.mxu0  ;;  %v2333_v54 = vpop.f32.mrf.mxu1 }
 0x5ee   :  { %v2342_v55 = vmul.f32 0.5, %v2338_v51  ;;  %v2339_v57 = vadd.f32 %v2292_v52, %v4415_v56  ;;  %v2341_v6 = vadd.f32 %v2333_v54, %v4417_v44 }
 0x5ef   :  { %v2294_v58 = vpop.f32.mrf.mxu0  ;;  %v2335_v59 = vpop.f32.mrf.mxu1 }
 0x5f0   :  { %3534 = vtanh.f32 %v2342_v55  ;;  %v2346_v1 = vmul.f32 0.5, %v2339_v57  ;;  %v2351_v4 = vmul.f32 0.5, %v2341_v6  ;;  %v4422_v58 = vld [vmem:[#allocation37_spill] sm:$0xff]  ;;  %v4423_v6 = vld [vmem:[#allocation38_spill] sm:$0xff] }
 0x5f1   :  { %v2295_v2 = vpop.f32.mrf.mxu0  ;;  %v2336_v3 = vpop.f32.mrf.mxu1 }
 0x5f2   :  { %3536 = vtanh.f32 %v2346_v1 }
 0x5f3   :  { %3538 = vtanh.f32 %v2340_v61 }
 0x5f4   :  { %3540 = vtanh.f32 %v2351_v4 }
 0x5fd   :  { %v3535_v5 = vpop.eup %3534 }
 0x5fe   :  { %v2344_v37 = vmul.f32 0.5, %v3535_v5 }
 0x5ff   :  { %v3537_v38 = vpop.eup %3536 }
 0x600   :  { %v2345_v39 = vadd.f32 0.5, %v2344_v37  ;;  %v2348_v40 = vmul.f32 0.5, %v3537_v38  ;;  %v3539_v41 = vpop.eup %3538 }
 0x601   :  { %v3541_v47 = vpop.eup %3540 }
 0x602   :  { %v2349_v63 = vadd.f32 0.5, %v2348_v40  ;;  %v2356_v43 = vmul.f32 %v3539_v41, %v2345_v39  ;;  %v2353_v48 = vmul.f32 0.5, %v3541_v47  ;;  %v4424_v39 = vld [vmem:[#allocation39_spill] sm:$0xff] }
 0x604   :  { %v2355_v45 = vmul.f32 %v2349_v63, %v4280_v42  ;;  %v2354_v35 = vadd.f32 0.5, %v2353_v48 }
 0x606   :  { %v4322_v46 = vadd.f32 %v2356_v43, %v2355_v45 }
 0x608   :  { %3542 = vtanh.f32 %v4322_v46 }
 0x615   :  { %v3543_v49 = vpop.eup %3542 }
 0x616   :  { %v2359_v50 = vmul.f32 %v3543_v49, %v2354_v35 }
 0x618   :  { %2361 = vst [vmem:[#allocation12 + $0x28] sm:$0xff] %v2359_v50  ;;  %v2369_v51 = vpack.c.bf16 %v2359_v50, %v2359_v50 }
 0x61a   :  { %2595 = vmatmul.mubr.bf16.vlgmr.msra.gmra.mxu0 %v2369_v51  ;;  %2636 = vmatmul.mubr.bf16.vlgmr.msra.gmra.mxu1 %v2369_v51 }
 0x61b   :  { %2869 = vmatpush1.bf16.msra.mxu0 %v4139_v7  ;;  %2910 = vmatpush1.bf16.msra.mxu1 %v4141_v28  ;;  %v4418_v28 = vld [vmem:[#allocation33_spill] sm:$0xff] }
 0x61c   :  { %2870 = vmatprep.subr.bf16.mxu0 %v4147_v24  ;;  %2911 = vmatprep.subr.bf16.mxu1 %v4149_v62 }
 0x61d   :  { %2900 = vmatprep.mubr.bf16.mxu0 %v4405_v14  ;;  %2941 = vmatprep.mubr.bf16.mxu1 %v4405_v14 }
 0x61f   :  { %2871 = vmatpush1.bf16.msra.mxu0 %v4151_v12  ;;  %2912 = vmatpush1.bf16.msra.mxu1 %v4153_v11 }
 0x620   :  { %2872 = vmatprep.subr.bf16.mxu0 %v4159_v8  ;;  %2913 = vmatprep.subr.bf16.mxu1 %v4161_v23  ;;  %v4419_v8 = vld [vmem:[#allocation35_spill] sm:$0xff] }
 0x623   :  { %2873 = vmatpush1.bf16.msra.mxu0 %v4163_v15  ;;  %2914 = vmatpush1.bf16.msra.mxu1 %v4165_v16 }
 0x624   :  { %2874 = vmatprep.subr.bf16.mxu0 %v4171_v17  ;;  %2915 = vmatprep.subr.bf16.mxu1 %v4173_v33  ;;  %v4420_v17 = vld [vmem:[#allocation34_spill] sm:$0xff] }
 0x627   :  { %2875 = vmatpush1.bf16.msra.mxu0 %v4175_v34  ;;  %2916 = vmatpush1.bf16.msra.mxu1 %v4177_v0 }
 0x628   :  { %2876 = vmatprep.subr.bf16.mxu0 %v4183_v25  ;;  %2917 = vmatprep.subr.bf16.mxu1 %v4185_v10  ;;  %v4421_v10 = vld [vmem:[#allocation36_spill] sm:$0xff] }
 0x62b   :  { %2877 = vmatpush1.bf16.msra.mxu0 %v4187_v19  ;;  %2918 = vmatpush1.bf16.msra.mxu1 %v4189_v21 }
 0x62c   :  { %2878 = vmatprep.subr.bf16.mxu0 %v4195_v29  ;;  %2919 = vmatprep.subr.bf16.mxu1 %v4197_v53 }
 0x62f   :  { %2879 = vmatpush1.bf16.msra.mxu0 %v4199_v9  ;;  %2920 = vmatpush1.bf16.msra.mxu1 %v4201_v13 }
 0x630   :  { %2880 = vmatprep.subr.bf16.mxu0 %v4207_v26  ;;  %2921 = vmatprep.subr.bf16.mxu1 %v4209_v22 }
 0x633   :  { %2881 = vmatpush1.bf16.msra.mxu0 %v4211_v20  ;;  %2922 = vmatpush1.bf16.msra.mxu1 %v4213_v27 }
 0x634   :  { %2882 = vmatprep.subr.bf16.mxu0 %v4219_v30  ;;  %2923 = vmatprep.subr.bf16.mxu1 %v4221_v31 }
 0x637   :  { %2883 = vmatpush1.bf16.msra.mxu0 %v4223_v18  ;;  %2924 = vmatpush1.bf16.msra.mxu1 %v4225_v36 }
 0x6da   :  { %v2596_v14 = vpop.f32.mrf.mxu0  ;;  %v2637_v7 = vpop.f32.mrf.mxu1 }
 0x6db   :  { %v2644_v24 = vadd.f32 %v2596_v14, %v4418_v28  ;;  %v2646_v33 = vadd.f32 %v2637_v7, %v4420_v17 }
 0x6dc   :  { %v2598_v62 = vpop.f32.mrf.mxu0  ;;  %v2639_v12 = vpop.f32.mrf.mxu1 }
 0x6dd   :  { %v2648_v11 = vmul.f32 0.5, %v2644_v24  ;;  %v2645_v23 = vadd.f32 %v2598_v62, %v4419_v8  ;;  %v2647_v19 = vadd.f32 %v2639_v12, %v4421_v10 }
 0x6de   :  { %v2600_v15 = vpop.f32.mrf.mxu0  ;;  %v2641_v16 = vpop.f32.mrf.mxu1 }
 0x6df   :  { %3544 = vtanh.f32 %v2648_v11  ;;  %v2652_v34 = vmul.f32 0.5, %v2645_v23  ;;  %v2657_v21 = vmul.f32 0.5, %v2647_v19 }
 0x6e0   :  { %v2601_v0 = vpop.f32.mrf.mxu0  ;;  %v2642_v25 = vpop.f32.mrf.mxu1 }
 0x6e1   :  { %3546 = vtanh.f32 %v2652_v34 }
 0x6e2   :  { %3548 = vtanh.f32 %v2646_v33 }
 0x6e3   :  { %3550 = vtanh.f32 %v2657_v21 }
 0x6ec   :  { %v3545_v29 = vpop.eup %3544 }
 0x6ed   :  { %v2650_v53 = vmul.f32 0.5, %v3545_v29 }
 0x6ee   :  { %v3547_v9 = vpop.eup %3546 }
 0x6ef   :  { %v2651_v13 = vadd.f32 0.5, %v2650_v53  ;;  %v2654_v26 = vmul.f32 0.5, %v3547_v9  ;;  %v3549_v22 = vpop.eup %3548 }
 0x6f0   :  { %v3551_v18 = vpop.eup %3550 }
 0x6f1   :  { %v2655_v20 = vadd.f32 0.5, %v2654_v26  ;;  %v2662_v27 = vmul.f32 %v3549_v22, %v2651_v13  ;;  %v2659_v36 = vmul.f32 0.5, %v3551_v18 }
 0x6f3   :  { %v2661_v30 = vmul.f32 %v2655_v20, %v4322_v46  ;;  %v2660_v42 = vadd.f32 0.5, %v2659_v36 }
 0x6f5   :  { %v2663_v31 = vadd.f32 %v2662_v27, %v2661_v30 }
 0x6f7   :  { %3552 = vtanh.f32 %v2663_v31 }
 0x704   :  { %v3553_v52 = vpop.eup %3552 }
 0x705   :  { %v2665_v54 = vmul.f32 %v3553_v52, %v2660_v42 }
 0x707   :  { %2667 = vst [vmem:[#allocation12 + $0x30] sm:$0xff] %v2665_v54  ;;  %v2675_v55 = vpack.c.bf16 %v2665_v54, %v2665_v54 }
 0x709   :  { %2901 = vmatmul.mubr.bf16.vlgmr.msra.gmra.mxu0 %v2675_v55  ;;  %2942 = vmatmul.mubr.bf16.vlgmr.msra.gmra.mxu1 %v2675_v55 }
 0x7c9   :  { %v2902_v56 = vpop.f32.mrf.mxu0  ;;  %v2943_v57 = vpop.f32.mrf.mxu1 }
 0x7ca   :  { %v2950_v59 = vadd.f32 %v2902_v56, %v4422_v58  ;;  %v2952_v4 = vadd.f32 %v2943_v57, %v4423_v6 }
 0x7cb   :  { %v2904_v60 = vpop.f32.mrf.mxu0  ;;  %v2945_v61 = vpop.f32.mrf.mxu1 }
 0x7cc   :  { %v2954_v1 = vmul.f32 0.5, %v2950_v59  ;;  %v2951_v2 = vadd.f32 %v2904_v60, %v4035_v32  ;;  %v2953_v40 = vadd.f32 %v2945_v61, %v4424_v39 }
 0x7cd   :  { %v2906_v3 = vpop.f32.mrf.mxu0  ;;  %v2947_v44 = vpop.f32.mrf.mxu1 }
 0x7ce   :  { %3554 = vtanh.f32 %v2954_v1  ;;  %v2958_v5 = vmul.f32 0.5, %v2951_v2  ;;  %v2963_v41 = vmul.f32 0.5, %v2953_v40 }
 0x7cf   :  { %v2907_v37 = vpop.f32.mrf.mxu0  ;;  %v2948_v38 = vpop.f32.mrf.mxu1 }
 0x7d0   :  { %3556 = vtanh.f32 %v2958_v5 }
 0x7d1   :  { %3558 = vtanh.f32 %v2952_v4 }
 0x7d2   :  { %3560 = vtanh.f32 %v2963_v41 }
 0x7db   :  { %v3555_v63 = vpop.eup %3554 }
 0x7dc   :  { %v2956_v43 = vmul.f32 0.5, %v3555_v63 }
 0x7dd   :  { %v3557_v45 = vpop.eup %3556 }
 0x7de   :  { %v2957_v46 = vadd.f32 0.5, %v2956_v43  ;;  %v2960_v47 = vmul.f32 0.5, %v3557_v45  ;;  %v3559_v32 = vpop.eup %3558 }
 0x7df   :  { %v3561_v51 = vpop.eup %3560 }
 0x7e0   :  { %v2961_v48 = vadd.f32 0.5, %v2960_v47  ;;  %v2968_v35 = vmul.f32 %v3559_v32, %v2957_v46  ;;  %v2965_v14 = vmul.f32 0.5, %v3561_v51 }
 0x7e2   :  { %v2967_v49 = vmul.f32 %v2961_v48, %v2663_v31  ;;  %v2966_v7 = vadd.f32 0.5, %v2965_v14 }
 0x7e4   :  { %v2969_v50 = vadd.f32 %v2968_v35, %v2967_v49 }
 0x7e6   :  { %3562 = vtanh.f32 %v2969_v50  ;;  %2975 = vst [vmem:[#allocation15] sm:$0xff] %v2969_v50 }
 0x7f3   :  { %v3563_v28 = vpop.eup %3562 }
 0x7f4   :  { %v2971_v24 = vmul.f32 %v3563_v28, %v2966_v7 }
 0x7f6   :  { %2973 = vst [vmem:[#allocation12 + $0x38] sm:$0xff] %v2971_v24  ;;  %2974 = vst [vmem:[#allocation13] sm:$0xff] %v2971_v24 }
 0x7f7   :  { %3675 = shalt.err (!%p3672_p1)
}
 0x7f8   :  { %2997 = dma.vmem_to_hbm [thread:$0]  %s2995_s30, 128, %s4382_s7, [#allocation14]  }
 0x7f9   :  { %s3684_s17 = scalar_lea.vmem %s2982_s11, 1024  ;;  %p3689_p3 = scmp.lt.s32.totalorder %s2982_s11, %s2982_s11 }
 0x7fa   :  { %p3685_p2 = scmp.ne.s32.totalorder %s2982_s11, %s3684_s17  ;;  %p3690_p4 = scmp.lt.s32.totalorder %s3684_s17, %s3684_s17 }
 0x7fc   :  { %p3691_p5 = por %p3690_p4, %p3689_p3 }
 0x7fe   :  { %p3692_p6 = pnand %p3691_p5, %p3685_p2 }
 0x800   :  { %3695 = shalt.err (!%p3692_p6)
}
 0x801   :  { %s3747_s18 = smov 128   ;;  %s3748_s19 = smov 8  }
 0x802   :  { %2987 = dma.vmem_to_hbm [thread:$0]  %s2982_s11, 1024, %s4381_s6, [#allocation5], %s3747_s18, %s3747_s18, %s3748_s19  }
 0x803   :  { %s3704_s21 = scalar_lea.vmem %s3005_s13, 128  ;;  %p3709_p8 = scmp.lt.s32.totalorder %s3005_s13, %s3005_s13 }
 0x804   :  { %p3705_p7 = scmp.ne.s32.totalorder %s3005_s13, %s3704_s21  ;;  %p3710_p9 = scmp.lt.s32.totalorder %s3704_s21, %s3704_s21 }
 0x806   :  { %p3711_p10 = por %p3710_p9, %p3709_p8 }
 0x808   :  { %p3712_p11 = pnand %p3711_p10, %p3705_p7 }
 0x80a   :  { %3715 = shalt.err (!%p3712_p11)
}
 0x80b   :  { %3007 = dma.vmem_to_hbm [thread:$0]  %s3005_s13, 128, %s4383_s8, [#allocation14]  }
 0x80c   :  { %3730 = dma.done.wait [#allocation5], 1024  }
 0x80d   :  { %3731 = vsyncadd [#allocation5], 4294966272 }
 0x80e   :  { %3732 = dma.done.wait [#allocation14], 256  }
 0x80f   :  { %3733 = vsyncadd [#allocation14], 4294967040 }
 0x810   :  { %3017 = vsyncpa [#allocation4], 1 }
 0x811   :  { %3018 = vsyncpa [#allocation7], 1 }
 0x812   :  { %3019 = vsyncpa [#allocation10], 1 }
 0x813   :  { %3020 = vsyncpa [#allocation5], 1 }
 0x814   :  { %3021 = vsyncpa [#allocation14], 1 }

</bundles_post_ra>
